<compile_context>
chip_gen: v6e
topology: v6e:2x2x1
jax: 0.10.0
libtpu: 0.0.40
codegen_flags: <defaults>
</compile_context>

<pallas_src>
import functools
import math

import jax
import jax.numpy as jnp
from jax.experimental import pallas as pl
from jax.experimental.pallas import tpu as pltpu  # noqa: F401  (not needed at this tiny size)


# ----------------------------------------------------------------------------
# Fused encoder-layer kernel: one invocation == the whole layer, all batches
# ----------------------------------------------------------------------------
def _encoder_layer_kernel(x_ref, wqkv_ref, wo_ref, w1_ref, w2_ref, vec_ref,
                          o_ref, *, num_heads, eps):
    L, B, E = x_ref.shape
    F = w1_ref.shape[1]
    dh = E // num_heads

    # ---- weights (VMEM-resident for the whole call) ----
    wqkv = wqkv_ref[...]            # (E, 3E) : [Wq*scale | Wk | Wv]
    wo   = wo_ref[...]              # (E, E)
    w1   = w1_ref[...]              # (E, F)
    w2   = w2_ref[...]              # (F, E)

    # ---- packed small-parameter slab (one DMA instead of 12) ----
    bqkv = vec_ref[0:1, 0:3 * E]    # (1, 3E) : [bq*scale | bk | bv]
    b1   = vec_ref[1:2, 0:F]        # (1, F)
    bo   = vec_ref[2:3, 0:E]        # (1, E)
    b2   = vec_ref[3:4, 0:E]
    g1   = vec_ref[4:5, 0:E]
    be1  = vec_ref[5:6, 0:E]
    g2   = vec_ref[6:7, 0:E]
    be2  = vec_ref[7:8, 0:E]

    for b in range(B):              # static unroll, B is tiny
        xb = x_ref[:, b, :]         # (L, E) slice of the (L, B, E) block

        # ---- fused QKV projection: one full-width MXU push ----
        qkv = jnp.dot(xb, wqkv, preferred_element_type=jnp.float32) + bqkv   # (L, 3E)
        q = qkv[:, 0:E]             # already scaled by 1/sqrt(dh) at pack time
        k = qkv[:, E:2 * E]
        v = qkv[:, 2 * E:3 * E]

        # ---- per-head attention (heads statically unrolled; L = dh = tiny) ----
        heads = []
        for h in range(num_heads):
            sl = slice(h * dh, (h + 1) * dh)
            qh, kh, vh = q[:, sl], k[:, sl], v[:, sl]
            # scores = qh @ kh^T without an explicit transpose
            s = jax.lax.dot_general(qh, kh, (((1,), (1,)), ((), ())),
                                    preferred_element_type=jnp.float32)      # (L, L)
            s = s - jnp.max(s, axis=-1, keepdims=True)
            p = jnp.exp(s)
            p = p / jnp.sum(p, axis=-1, keepdims=True)                        # exact softmax
            heads.append(jnp.dot(p, vh, preferred_element_type=jnp.float32))  # (L, dh)
        attn = jnp.concatenate(heads, axis=1)                                 # (L, E)
        attn = jnp.dot(attn, wo, preferred_element_type=jnp.float32) + bo     # out-proj

        # ---- residual + LayerNorm 1 ----
        z = xb + attn
        mu = jnp.mean(z, axis=-1, keepdims=True)
        zc = z - mu
        var = jnp.mean(zc * zc, axis=-1, keepdims=True)
        s1 = zc * jax.lax.rsqrt(var + eps) * g1 + be1

        # ---- feed-forward: linear -> ReLU -> linear ----
        h1 = jnp.dot(s1, w1, preferred_element_type=jnp.float32) + b1
        h1 = jnp.maximum(h1, 0.0)
        ff = jnp.dot(h1, w2, preferred_element_type=jnp.float32) + b2

        # ---- residual + LayerNorm 2 ----
        z2 = s1 + ff
        mu2 = jnp.mean(z2, axis=-1, keepdims=True)
        zc2 = z2 - mu2
        var2 = jnp.mean(zc2 * zc2, axis=-1, keepdims=True)
        o_ref[:, b, :] = zc2 * jax.lax.rsqrt(var2 + eps) * g2 + be2


def encoder_layer_forward(src, p, num_heads, eps=1e-5):
    """MyTransformerEncoderLayer.forward (dropout off, masks=None).
    src: (src_len, batch, embed_dim) -> same shape.  One kernel launch,
    no wrapper-side transposes/reshapes."""
    L, B, E = src.shape
    return pl.pallas_call(
        functools.partial(_encoder_layer_kernel, num_heads=num_heads, eps=eps),
        out_shape=jax.ShapeDtypeStruct((L, B, E), src.dtype),
    )(src, p["wqkv"], p["wo"], p["lin1_w"], p["lin2_w"], p["vec_slab"])


# ----------------------------------------------------------------------------
# Parameters: built once, pre-packed into the kernel's layout
# (fused QKV weight with 1/sqrt(dh) folded in, one slab for all small vectors)
# ----------------------------------------------------------------------------
def make_layer_params(key, embed_dim, num_heads, dim_ff):
    E, H, F = embed_dim, num_heads, dim_ff
    assert E % H == 0
    dh = E // H
    scale = 1.0 / math.sqrt(dh)
    ks = jax.random.split(key, 12)

    def xavier(k, fan_in, fan_out):
        bound = math.sqrt(6.0 / (fan_in + fan_out))
        return jax.random.uniform(k, (fan_in, fan_out), jnp.float32, -bound, bound)

    def lin_bias(k, fan_in, n):
        bound = 1.0 / math.sqrt(fan_in)
        return jax.random.uniform(k, (n,), jnp.float32, -bound, bound)

    # "math" layout (in, out): y = x @ W + b
    wq, bq = xavier(ks[0], E, E), lin_bias(ks[1], E, E)
    wk, bk = xavier(ks[2], E, E), lin_bias(ks[3], E, E)
    wv, bv = xavier(ks[4], E, E), lin_bias(ks[5], E, E)
    wo, bo = xavier(ks[6], E, E), lin_bias(ks[7], E, E)
    w1, b1 = xavier(ks[8], E, F), lin_bias(ks[9], E, F)
    w2, b2 = xavier(ks[10], F, E), lin_bias(ks[11], F, E)
    n1w, n1b = jnp.ones((E,), jnp.float32), jnp.zeros((E,), jnp.float32)
    n2w, n2b = jnp.ones((E,), jnp.float32), jnp.zeros((E,), jnp.float32)

    ref_params = dict(wq=wq, bq=bq, wk=wk, bk=bk, wv=wv, bv=bv, wo=wo, bo=bo,
                      lin1_w=w1, lin1_b=b1, lin2_w=w2, lin2_b=b2,
                      norm1_w=n1w, norm1_b=n1b, norm2_w=n2w, norm2_b=n2b)

    # --- kernel layout ---
    width = max(3 * E, F)
    slab = jnp.zeros((8, width), jnp.float32)
    slab = slab.at[0, :3 * E].set(jnp.concatenate([bq * scale, bk, bv]))
    slab = slab.at[1, :F].set(b1)
    slab = slab.at[2, :E].set(bo)
    slab = slab.at[3, :E].set(b2)
    slab = slab.at[4, :E].set(n1w)
    slab = slab.at[5, :E].set(n1b)
    slab = slab.at[6, :E].set(n2w)
    slab = slab.at[7, :E].set(n2b)

    kernel_params = dict(
        wqkv=jnp.concatenate([wq * scale, wk, wv], axis=1),   # (E, 3E), scale folded in
        wo=wo,                                                # (E, E)
        lin1_w=w1, lin2_w=w2,                                 # (E, F), (F, E)
        vec_slab=slab,                                        # (8, max(3E, F))
    )
    return kernel_params, ref_params


# ----------------------------------------------------------------------------
# Pure-JAX reference (mirrors the PyTorch forward exactly; dropout off)
# ----------------------------------------------------------------------------
def reference_forward(src, rp, num_heads, eps=1e-5):
    L, B, E = src.shape
    H = num_heads
    dh = E // H
    x = src.reshape(L * B, E)

    q = (x @ rp["wq"] + rp["bq"]) * (dh ** -0.5)
    k = x @ rp["wk"] + rp["bk"]
    v = x @ rp["wv"] + rp["bv"]

    def split_heads(t):   # (L*B, E) -> (B*H, L, dh), matching PyTorch reshape/transpose
        return t.reshape(L, B * H, dh).transpose(1, 0, 2)

    q, k, v = split_heads(q), split_heads(k), split_heads(v)
    s = jnp.einsum("bqd,bkd->bqk", q, k)
    p = jax.nn.softmax(s, axis=-1)
    o = jnp.einsum("bqk,bkd->bqd", p, v)
    o = o.transpose(1, 0, 2).reshape(L * B, E)
    attn = o @ rp["wo"] + rp["bo"]

    def ln(z, g, b):
        mu = z.mean(-1, keepdims=True)
        var = ((z - mu) ** 2).mean(-1, keepdims=True)
        return (z - mu) / jnp.sqrt(var + eps) * g + b

    s1 = ln(x + attn, rp["norm1_w"], rp["norm1_b"])
    ffn = jnp.maximum(s1 @ rp["lin1_w"] + rp["lin1_b"], 0.0) @ rp["lin2_w"] + rp["lin2_b"]
    out = ln(s1 + ffn, rp["norm2_w"], rp["norm2_b"])
    return out.reshape(L, B, E)


if __name__ == "__main__":
    # shapes implied by the module's forward: src [src_len, batch, embed_dim]
    SRC_LEN, BATCH, EMBED = 8, 2, 32
    NUM_HEADS, DIM_FF = 4, 64

    root = jax.random.PRNGKey(0)
    k_src, k_par = jax.random.split(root)
    src = jax.random.normal(k_src, (SRC_LEN, BATCH, EMBED), jnp.float32)
    kparams, rparams = make_layer_params(k_par, EMBED, NUM_HEADS, DIM_FF)

    fwd = jax.jit(functools.partial(encoder_layer_forward, num_heads=NUM_HEADS))
    out = jax.block_until_ready(fwd(src, kparams))

    ref = reference_forward(src, rparams, NUM_HEADS)
    assert out.shape == (SRC_LEN, BATCH, EMBED)
    assert bool(jnp.all(jnp.isfinite(out)))
    max_err = float(jnp.max(jnp.abs(out - ref)))
    assert max_err < 1e-3, f"mismatch vs reference: max abs err {max_err}"
    print("KERNEL_OK")
</pallas_src>

<mosaic_0001>
module attributes {stable_mosaic.version = 11 : i64} {
  func.func @_encoder_layer_kernel(%arg0: memref<8x2x32xf32, #tpu.memory_space<vmem>>, %arg1: memref<32x96xf32, #tpu.memory_space<vmem>>, %arg2: memref<32x32xf32, #tpu.memory_space<vmem>>, %arg3: memref<32x64xf32, #tpu.memory_space<vmem>>, %arg4: memref<64x32xf32, #tpu.memory_space<vmem>>, %arg5: memref<8x96xf32, #tpu.memory_space<vmem>>, %arg6: memref<8x2x32xf32, #tpu.memory_space<vmem>>) attributes {dimension_semantics = [], scalar_prefetch = 0 : i64, scratch_operands = 0 : i64, tpu.core_type = #tpu.core_type<tc>} {
    %c0 = arith.constant 0 : index
    %c0_0 = arith.constant 0 : index
    %0 = vector.load %arg1[%c0, %c0_0] : memref<32x96xf32, #tpu.memory_space<vmem>>, vector<32x96xf32>
    %c0_1 = arith.constant 0 : index
    %c0_2 = arith.constant 0 : index
    %1 = vector.load %arg2[%c0_1, %c0_2] : memref<32x32xf32, #tpu.memory_space<vmem>>, vector<32x32xf32>
    %c0_3 = arith.constant 0 : index
    %c0_4 = arith.constant 0 : index
    %2 = vector.load %arg3[%c0_3, %c0_4] : memref<32x64xf32, #tpu.memory_space<vmem>>, vector<32x64xf32>
    %c0_5 = arith.constant 0 : index
    %c0_6 = arith.constant 0 : index
    %3 = vector.load %arg4[%c0_5, %c0_6] : memref<64x32xf32, #tpu.memory_space<vmem>>, vector<64x32xf32>
    %c0_7 = arith.constant 0 : index
    %c0_8 = arith.constant 0 : index
    %4 = vector.load %arg5[%c0_7, %c0_8] : memref<8x96xf32, #tpu.memory_space<vmem>>, vector<1x96xf32>
    %c1 = arith.constant 1 : index
    %c0_9 = arith.constant 0 : index
    %5 = vector.load %arg5[%c1, %c0_9] : memref<8x96xf32, #tpu.memory_space<vmem>>, vector<1x64xf32>
    %c2 = arith.constant 2 : index
    %c0_10 = arith.constant 0 : index
    %6 = vector.load %arg5[%c2, %c0_10] : memref<8x96xf32, #tpu.memory_space<vmem>>, vector<1x32xf32>
    %c3 = arith.constant 3 : index
    %c0_11 = arith.constant 0 : index
    %7 = vector.load %arg5[%c3, %c0_11] : memref<8x96xf32, #tpu.memory_space<vmem>>, vector<1x32xf32>
    %c4 = arith.constant 4 : index
    %c0_12 = arith.constant 0 : index
    %8 = vector.load %arg5[%c4, %c0_12] : memref<8x96xf32, #tpu.memory_space<vmem>>, vector<1x32xf32>
    %c5 = arith.constant 5 : index
    %c0_13 = arith.constant 0 : index
    %9 = vector.load %arg5[%c5, %c0_13] : memref<8x96xf32, #tpu.memory_space<vmem>>, vector<1x32xf32>
    %c6 = arith.constant 6 : index
    %c0_14 = arith.constant 0 : index
    %10 = vector.load %arg5[%c6, %c0_14] : memref<8x96xf32, #tpu.memory_space<vmem>>, vector<1x32xf32>
    %c7 = arith.constant 7 : index
    %c0_15 = arith.constant 0 : index
    %11 = vector.load %arg5[%c7, %c0_15] : memref<8x96xf32, #tpu.memory_space<vmem>>, vector<1x32xf32>
    %c0_16 = arith.constant 0 : index
    %c0_17 = arith.constant 0 : index
    %c0_18 = arith.constant 0 : index
    %12 = vector.load %arg0[%c0_16, %c0_17, %c0_18] : memref<8x2x32xf32, #tpu.memory_space<vmem>>, vector<8x1x32xf32>
    %13 = vector.shape_cast %12 : vector<8x1x32xf32> to vector<8x32xf32>
    %cst = arith.constant dense<0.000000e+00> : vector<8x96xf32>
    %14 = tpu.matmul %13, %0, %cst {dimension_numbers = #tpu.dot_dimension_numbers<[1], [0], [0], [1], [0, 0, 1, 1], [], []>} : vector<8x32xf32>, vector<32x96xf32>, vector<8x96xf32> -> vector<8x96xf32>
    %15 = vector.broadcast %4 : vector<1x96xf32> to vector<8x96xf32>
    %16 = arith.addf %14, %15 : vector<8x96xf32>
    %17 = vector.extract_strided_slice %16 {offsets = [0, 0], sizes = [8, 32], strides = [1, 1]} : vector<8x96xf32> to vector<8x32xf32>
    %18 = vector.extract_strided_slice %16 {offsets = [0, 32], sizes = [8, 32], strides = [1, 1]} : vector<8x96xf32> to vector<8x32xf32>
    %19 = vector.extract_strided_slice %16 {offsets = [0, 64], sizes = [8, 32], strides = [1, 1]} : vector<8x96xf32> to vector<8x32xf32>
    %20 = vector.extract_strided_slice %17 {offsets = [0, 0], sizes = [8, 8], strides = [1, 1]} : vector<8x32xf32> to vector<8x8xf32>
    %21 = vector.extract_strided_slice %18 {offsets = [0, 0], sizes = [8, 8], strides = [1, 1]} : vector<8x32xf32> to vector<8x8xf32>
    %22 = vector.extract_strided_slice %19 {offsets = [0, 0], sizes = [8, 8], strides = [1, 1]} : vector<8x32xf32> to vector<8x8xf32>
    %cst_19 = arith.constant dense<0.000000e+00> : vector<8x8xf32>
    %23 = tpu.matmul %20, %21, %cst_19 {dimension_numbers = #tpu.dot_dimension_numbers<[1], [1], [0], [0], [0, 0, 1, 0], [], []>} : vector<8x8xf32>, vector<8x8xf32>, vector<8x8xf32> -> vector<8x8xf32>
    %cst_20 = arith.constant dense<0xFF800000> : vector<8xf32>
    %24 = vector.multi_reduction <maximumf>, %23, %cst_20 [1] : vector<8x8xf32> to vector<8xf32>
    %25 = vector.shape_cast %24 : vector<8xf32> to vector<8x1xf32>
    %26 = vector.broadcast %25 : vector<8x1xf32> to vector<8x8xf32>
    %27 = arith.subf %23, %26 : vector<8x8xf32>
    %28 = math.exp %27 : vector<8x8xf32>
    %cst_21 = arith.constant dense<0.000000e+00> : vector<8xf32>
    %29 = vector.multi_reduction <add>, %28, %cst_21 [1] : vector<8x8xf32> to vector<8xf32>
    %30 = vector.shape_cast %29 : vector<8xf32> to vector<8x1xf32>
    %31 = vector.broadcast %30 : vector<8x1xf32> to vector<8x8xf32>
    %32 = arith.divf %28, %31 : vector<8x8xf32>
    %cst_22 = arith.constant dense<0.000000e+00> : vector<8x8xf32>
    %33 = tpu.matmul %32, %22, %cst_22 {dimension_numbers = #tpu.dot_dimension_numbers<[1], [0], [0], [1], [0, 0, 1, 1], [], []>} : vector<8x8xf32>, vector<8x8xf32>, vector<8x8xf32> -> vector<8x8xf32>
    %34 = vector.extract_strided_slice %17 {offsets = [0, 8], sizes = [8, 8], strides = [1, 1]} : vector<8x32xf32> to vector<8x8xf32>
    %35 = vector.extract_strided_slice %18 {offsets = [0, 8], sizes = [8, 8], strides = [1, 1]} : vector<8x32xf32> to vector<8x8xf32>
    %36 = vector.extract_strided_slice %19 {offsets = [0, 8], sizes = [8, 8], strides = [1, 1]} : vector<8x32xf32> to vector<8x8xf32>
    %cst_23 = arith.constant dense<0.000000e+00> : vector<8x8xf32>
    %37 = tpu.matmul %34, %35, %cst_23 {dimension_numbers = #tpu.dot_dimension_numbers<[1], [1], [0], [0], [0, 0, 1, 0], [], []>} : vector<8x8xf32>, vector<8x8xf32>, vector<8x8xf32> -> vector<8x8xf32>
    %cst_24 = arith.constant dense<0xFF800000> : vector<8xf32>
    %38 = vector.multi_reduction <maximumf>, %37, %cst_24 [1] : vector<8x8xf32> to vector<8xf32>
    %39 = vector.shape_cast %38 : vector<8xf32> to vector<8x1xf32>
    %40 = vector.broadcast %39 : vector<8x1xf32> to vector<8x8xf32>
    %41 = arith.subf %37, %40 : vector<8x8xf32>
    %42 = math.exp %41 : vector<8x8xf32>
    %cst_25 = arith.constant dense<0.000000e+00> : vector<8xf32>
    %43 = vector.multi_reduction <add>, %42, %cst_25 [1] : vector<8x8xf32> to vector<8xf32>
    %44 = vector.shape_cast %43 : vector<8xf32> to vector<8x1xf32>
    %45 = vector.broadcast %44 : vector<8x1xf32> to vector<8x8xf32>
    %46 = arith.divf %42, %45 : vector<8x8xf32>
    %cst_26 = arith.constant dense<0.000000e+00> : vector<8x8xf32>
    %47 = tpu.matmul %46, %36, %cst_26 {dimension_numbers = #tpu.dot_dimension_numbers<[1], [0], [0], [1], [0, 0, 1, 1], [], []>} : vector<8x8xf32>, vector<8x8xf32>, vector<8x8xf32> -> vector<8x8xf32>
    %48 = vector.extract_strided_slice %17 {offsets = [0, 16], sizes = [8, 8], strides = [1, 1]} : vector<8x32xf32> to vector<8x8xf32>
    %49 = vector.extract_strided_slice %18 {offsets = [0, 16], sizes = [8, 8], strides = [1, 1]} : vector<8x32xf32> to vector<8x8xf32>
    %50 = vector.extract_strided_slice %19 {offsets = [0, 16], sizes = [8, 8], strides = [1, 1]} : vector<8x32xf32> to vector<8x8xf32>
    %cst_27 = arith.constant dense<0.000000e+00> : vector<8x8xf32>
    %51 = tpu.matmul %48, %49, %cst_27 {dimension_numbers = #tpu.dot_dimension_numbers<[1], [1], [0], [0], [0, 0, 1, 0], [], []>} : vector<8x8xf32>, vector<8x8xf32>, vector<8x8xf32> -> vector<8x8xf32>
    %cst_28 = arith.constant dense<0xFF800000> : vector<8xf32>
    %52 = vector.multi_reduction <maximumf>, %51, %cst_28 [1] : vector<8x8xf32> to vector<8xf32>
    %53 = vector.shape_cast %52 : vector<8xf32> to vector<8x1xf32>
    %54 = vector.broadcast %53 : vector<8x1xf32> to vector<8x8xf32>
    %55 = arith.subf %51, %54 : vector<8x8xf32>
    %56 = math.exp %55 : vector<8x8xf32>
    %cst_29 = arith.constant dense<0.000000e+00> : vector<8xf32>
    %57 = vector.multi_reduction <add>, %56, %cst_29 [1] : vector<8x8xf32> to vector<8xf32>
    %58 = vector.shape_cast %57 : vector<8xf32> to vector<8x1xf32>
    %59 = vector.broadcast %58 : vector<8x1xf32> to vector<8x8xf32>
    %60 = arith.divf %56, %59 : vector<8x8xf32>
    %cst_30 = arith.constant dense<0.000000e+00> : vector<8x8xf32>
    %61 = tpu.matmul %60, %50, %cst_30 {dimension_numbers = #tpu.dot_dimension_numbers<[1], [0], [0], [1], [0, 0, 1, 1], [], []>} : vector<8x8xf32>, vector<8x8xf32>, vector<8x8xf32> -> vector<8x8xf32>
    %62 = vector.extract_strided_slice %17 {offsets = [0, 24], sizes = [8, 8], strides = [1, 1]} : vector<8x32xf32> to vector<8x8xf32>
    %63 = vector.extract_strided_slice %18 {offsets = [0, 24], sizes = [8, 8], strides = [1, 1]} : vector<8x32xf32> to vector<8x8xf32>
    %64 = vector.extract_strided_slice %19 {offsets = [0, 24], sizes = [8, 8], strides = [1, 1]} : vector<8x32xf32> to vector<8x8xf32>
    %cst_31 = arith.constant dense<0.000000e+00> : vector<8x8xf32>
    %65 = tpu.matmul %62, %63, %cst_31 {dimension_numbers = #tpu.dot_dimension_numbers<[1], [1], [0], [0], [0, 0, 1, 0], [], []>} : vector<8x8xf32>, vector<8x8xf32>, vector<8x8xf32> -> vector<8x8xf32>
    %cst_32 = arith.constant dense<0xFF800000> : vector<8xf32>
    %66 = vector.multi_reduction <maximumf>, %65, %cst_32 [1] : vector<8x8xf32> to vector<8xf32>
    %67 = vector.shape_cast %66 : vector<8xf32> to vector<8x1xf32>
    %68 = vector.broadcast %67 : vector<8x1xf32> to vector<8x8xf32>
    %69 = arith.subf %65, %68 : vector<8x8xf32>
    %70 = math.exp %69 : vector<8x8xf32>
    %cst_33 = arith.constant dense<0.000000e+00> : vector<8xf32>
    %71 = vector.multi_reduction <add>, %70, %cst_33 [1] : vector<8x8xf32> to vector<8xf32>
    %72 = vector.shape_cast %71 : vector<8xf32> to vector<8x1xf32>
    %73 = vector.broadcast %72 : vector<8x1xf32> to vector<8x8xf32>
    %74 = arith.divf %70, %73 : vector<8x8xf32>
    %cst_34 = arith.constant dense<0.000000e+00> : vector<8x8xf32>
    %75 = tpu.matmul %74, %64, %cst_34 {dimension_numbers = #tpu.dot_dimension_numbers<[1], [0], [0], [1], [0, 0, 1, 1], [], []>} : vector<8x8xf32>, vector<8x8xf32>, vector<8x8xf32> -> vector<8x8xf32>
    %76 = tpu.concatenate %33, %47, %61, %75 in 1 : vector<8x8xf32>, vector<8x8xf32>, vector<8x8xf32>, vector<8x8xf32> -> vector<8x32xf32>
    %cst_35 = arith.constant dense<0.000000e+00> : vector<8x32xf32>
    %77 = tpu.matmul %76, %1, %cst_35 {dimension_numbers = #tpu.dot_dimension_numbers<[1], [0], [0], [1], [0, 0, 1, 1], [], []>} : vector<8x32xf32>, vector<32x32xf32>, vector<8x32xf32> -> vector<8x32xf32>
    %78 = vector.broadcast %6 : vector<1x32xf32> to vector<8x32xf32>
    %79 = arith.addf %77, %78 : vector<8x32xf32>
    %80 = arith.addf %13, %79 : vector<8x32xf32>
    %cst_36 = arith.constant dense<0.000000e+00> : vector<8xf32>
    %81 = vector.multi_reduction <add>, %80, %cst_36 [1] : vector<8x32xf32> to vector<8xf32>
    %82 = vector.shape_cast %81 : vector<8xf32> to vector<8x1xf32>
    %cst_37 = arith.constant 3.200000e+01 : f32
    %83 = vector.broadcast %cst_37 : f32 to vector<8x1xf32>
    %84 = arith.divf %82, %83 : vector<8x1xf32>
    %85 = vector.broadcast %84 : vector<8x1xf32> to vector<8x32xf32>
    %86 = arith.subf %80, %85 : vector<8x32xf32>
    %87 = arith.mulf %86, %86 : vector<8x32xf32>
    %cst_38 = arith.constant dense<0.000000e+00> : vector<8xf32>
    %88 = vector.multi_reduction <add>, %87, %cst_38 [1] : vector<8x32xf32> to vector<8xf32>
    %89 = vector.shape_cast %88 : vector<8xf32> to vector<8x1xf32>
    %cst_39 = arith.constant 3.200000e+01 : f32
    %90 = vector.broadcast %cst_39 : f32 to vector<8x1xf32>
    %91 = arith.divf %89, %90 : vector<8x1xf32>
    %cst_40 = arith.constant 9.99999974E-6 : f32
    %92 = vector.broadcast %cst_40 : f32 to vector<8x1xf32>
    %93 = arith.addf %91, %92 : vector<8x1xf32>
    %94 = math.rsqrt %93 : vector<8x1xf32>
    %95 = vector.broadcast %94 : vector<8x1xf32> to vector<8x32xf32>
    %96 = arith.mulf %86, %95 : vector<8x32xf32>
    %97 = vector.broadcast %8 : vector<1x32xf32> to vector<8x32xf32>
    %98 = arith.mulf %96, %97 : vector<8x32xf32>
    %99 = vector.broadcast %9 : vector<1x32xf32> to vector<8x32xf32>
    %100 = arith.addf %98, %99 : vector<8x32xf32>
    %cst_41 = arith.constant dense<0.000000e+00> : vector<8x64xf32>
    %101 = tpu.matmul %100, %2, %cst_41 {dimension_numbers = #tpu.dot_dimension_numbers<[1], [0], [0], [1], [0, 0, 1, 1], [], []>} : vector<8x32xf32>, vector<32x64xf32>, vector<8x64xf32> -> vector<8x64xf32>
    %102 = vector.broadcast %5 : vector<1x64xf32> to vector<8x64xf32>
    %103 = arith.addf %101, %102 : vector<8x64xf32>
    %cst_42 = arith.constant 0.000000e+00 : f32
    %104 = vector.broadcast %cst_42 : f32 to vector<8x64xf32>
    %105 = arith.maximumf %103, %104 : vector<8x64xf32>
    %cst_43 = arith.constant dense<0.000000e+00> : vector<8x32xf32>
    %106 = tpu.matmul %105, %3, %cst_43 {dimension_numbers = #tpu.dot_dimension_numbers<[1], [0], [0], [1], [0, 0, 1, 1], [], []>} : vector<8x64xf32>, vector<64x32xf32>, vector<8x32xf32> -> vector<8x32xf32>
    %107 = vector.broadcast %7 : vector<1x32xf32> to vector<8x32xf32>
    %108 = arith.addf %106, %107 : vector<8x32xf32>
    %109 = arith.addf %100, %108 : vector<8x32xf32>
    %cst_44 = arith.constant dense<0.000000e+00> : vector<8xf32>
    %110 = vector.multi_reduction <add>, %109, %cst_44 [1] : vector<8x32xf32> to vector<8xf32>
    %111 = vector.shape_cast %110 : vector<8xf32> to vector<8x1xf32>
    %cst_45 = arith.constant 3.200000e+01 : f32
    %112 = vector.broadcast %cst_45 : f32 to vector<8x1xf32>
    %113 = arith.divf %111, %112 : vector<8x1xf32>
    %114 = vector.broadcast %113 : vector<8x1xf32> to vector<8x32xf32>
    %115 = arith.subf %109, %114 : vector<8x32xf32>
    %116 = arith.mulf %115, %115 : vector<8x32xf32>
    %cst_46 = arith.constant dense<0.000000e+00> : vector<8xf32>
    %117 = vector.multi_reduction <add>, %116, %cst_46 [1] : vector<8x32xf32> to vector<8xf32>
    %118 = vector.shape_cast %117 : vector<8xf32> to vector<8x1xf32>
    %cst_47 = arith.constant 3.200000e+01 : f32
    %119 = vector.broadcast %cst_47 : f32 to vector<8x1xf32>
    %120 = arith.divf %118, %119 : vector<8x1xf32>
    %cst_48 = arith.constant 9.99999974E-6 : f32
    %121 = vector.broadcast %cst_48 : f32 to vector<8x1xf32>
    %122 = arith.addf %120, %121 : vector<8x1xf32>
    %123 = math.rsqrt %122 : vector<8x1xf32>
    %124 = vector.broadcast %123 : vector<8x1xf32> to vector<8x32xf32>
    %125 = arith.mulf %115, %124 : vector<8x32xf32>
    %126 = vector.broadcast %10 : vector<1x32xf32> to vector<8x32xf32>
    %127 = arith.mulf %125, %126 : vector<8x32xf32>
    %128 = vector.broadcast %11 : vector<1x32xf32> to vector<8x32xf32>
    %129 = arith.addf %127, %128 : vector<8x32xf32>
    %c0_49 = arith.constant 0 : index
    %c0_50 = arith.constant 0 : index
    %c0_51 = arith.constant 0 : index
    %130 = vector.load %arg6[%c0_49, %c0_50, %c0_51] : memref<8x2x32xf32, #tpu.memory_space<vmem>>, vector<8x1x32xf32>
    %131 = vector.shape_cast %130 : vector<8x1x32xf32> to vector<8x32xf32>
    %132 = vector.shape_cast %129 : vector<8x32xf32> to vector<8x1x32xf32>
    tpu.vector_store %arg6[%c0_49, %c0_50, %c0_51], %132 {strides = array<i32>} : memref<8x2x32xf32, #tpu.memory_space<vmem>>, vector<8x1x32xf32>,
    %c0_52 = arith.constant 0 : index
    %c1_53 = arith.constant 1 : index
    %c0_54 = arith.constant 0 : index
    %133 = vector.load %arg0[%c0_52, %c1_53, %c0_54] : memref<8x2x32xf32, #tpu.memory_space<vmem>>, vector<8x1x32xf32>
    %134 = vector.shape_cast %133 : vector<8x1x32xf32> to vector<8x32xf32>
    %cst_55 = arith.constant dense<0.000000e+00> : vector<8x96xf32>
    %135 = tpu.matmul %134, %0, %cst_55 {dimension_numbers = #tpu.dot_dimension_numbers<[1], [0], [0], [1], [0, 0, 1, 1], [], []>} : vector<8x32xf32>, vector<32x96xf32>, vector<8x96xf32> -> vector<8x96xf32>
    %136 = vector.broadcast %4 : vector<1x96xf32> to vector<8x96xf32>
    %137 = arith.addf %135, %136 : vector<8x96xf32>
    %138 = vector.extract_strided_slice %137 {offsets = [0, 0], sizes = [8, 32], strides = [1, 1]} : vector<8x96xf32> to vector<8x32xf32>
    %139 = vector.extract_strided_slice %137 {offsets = [0, 32], sizes = [8, 32], strides = [1, 1]} : vector<8x96xf32> to vector<8x32xf32>
    %140 = vector.extract_strided_slice %137 {offsets = [0, 64], sizes = [8, 32], strides = [1, 1]} : vector<8x96xf32> to vector<8x32xf32>
    %141 = vector.extract_strided_slice %138 {offsets = [0, 0], sizes = [8, 8], strides = [1, 1]} : vector<8x32xf32> to vector<8x8xf32>
    %142 = vector.extract_strided_slice %139 {offsets = [0, 0], sizes = [8, 8], strides = [1, 1]} : vector<8x32xf32> to vector<8x8xf32>
    %143 = vector.extract_strided_slice %140 {offsets = [0, 0], sizes = [8, 8], strides = [1, 1]} : vector<8x32xf32> to vector<8x8xf32>
    %cst_56 = arith.constant dense<0.000000e+00> : vector<8x8xf32>
    %144 = tpu.matmul %141, %142, %cst_56 {dimension_numbers = #tpu.dot_dimension_numbers<[1], [1], [0], [0], [0, 0, 1, 0], [], []>} : vector<8x8xf32>, vector<8x8xf32>, vector<8x8xf32> -> vector<8x8xf32>
    %cst_57 = arith.constant dense<0xFF800000> : vector<8xf32>
    %145 = vector.multi_reduction <maximumf>, %144, %cst_57 [1] : vector<8x8xf32> to vector<8xf32>
    %146 = vector.shape_cast %145 : vector<8xf32> to vector<8x1xf32>
    %147 = vector.broadcast %146 : vector<8x1xf32> to vector<8x8xf32>
    %148 = arith.subf %144, %147 : vector<8x8xf32>
    %149 = math.exp %148 : vector<8x8xf32>
    %cst_58 = arith.constant dense<0.000000e+00> : vector<8xf32>
    %150 = vector.multi_reduction <add>, %149, %cst_58 [1] : vector<8x8xf32> to vector<8xf32>
    %151 = vector.shape_cast %150 : vector<8xf32> to vector<8x1xf32>
    %152 = vector.broadcast %151 : vector<8x1xf32> to vector<8x8xf32>
    %153 = arith.divf %149, %152 : vector<8x8xf32>
    %cst_59 = arith.constant dense<0.000000e+00> : vector<8x8xf32>
    %154 = tpu.matmul %153, %143, %cst_59 {dimension_numbers = #tpu.dot_dimension_numbers<[1], [0], [0], [1], [0, 0, 1, 1], [], []>} : vector<8x8xf32>, vector<8x8xf32>, vector<8x8xf32> -> vector<8x8xf32>
    %155 = vector.extract_strided_slice %138 {offsets = [0, 8], sizes = [8, 8], strides = [1, 1]} : vector<8x32xf32> to vector<8x8xf32>
    %156 = vector.extract_strided_slice %139 {offsets = [0, 8], sizes = [8, 8], strides = [1, 1]} : vector<8x32xf32> to vector<8x8xf32>
    %157 = vector.extract_strided_slice %140 {offsets = [0, 8], sizes = [8, 8], strides = [1, 1]} : vector<8x32xf32> to vector<8x8xf32>
    %cst_60 = arith.constant dense<0.000000e+00> : vector<8x8xf32>
    %158 = tpu.matmul %155, %156, %cst_60 {dimension_numbers = #tpu.dot_dimension_numbers<[1], [1], [0], [0], [0, 0, 1, 0], [], []>} : vector<8x8xf32>, vector<8x8xf32>, vector<8x8xf32> -> vector<8x8xf32>
    %cst_61 = arith.constant dense<0xFF800000> : vector<8xf32>
    %159 = vector.multi_reduction <maximumf>, %158, %cst_61 [1] : vector<8x8xf32> to vector<8xf32>
    %160 = vector.shape_cast %159 : vector<8xf32> to vector<8x1xf32>
    %161 = vector.broadcast %160 : vector<8x1xf32> to vector<8x8xf32>
    %162 = arith.subf %158, %161 : vector<8x8xf32>
    %163 = math.exp %162 : vector<8x8xf32>
    %cst_62 = arith.constant dense<0.000000e+00> : vector<8xf32>
    %164 = vector.multi_reduction <add>, %163, %cst_62 [1] : vector<8x8xf32> to vector<8xf32>
    %165 = vector.shape_cast %164 : vector<8xf32> to vector<8x1xf32>
    %166 = vector.broadcast %165 : vector<8x1xf32> to vector<8x8xf32>
    %167 = arith.divf %163, %166 : vector<8x8xf32>
    %cst_63 = arith.constant dense<0.000000e+00> : vector<8x8xf32>
    %168 = tpu.matmul %167, %157, %cst_63 {dimension_numbers = #tpu.dot_dimension_numbers<[1], [0], [0], [1], [0, 0, 1, 1], [], []>} : vector<8x8xf32>, vector<8x8xf32>, vector<8x8xf32> -> vector<8x8xf32>
    %169 = vector.extract_strided_slice %138 {offsets = [0, 16], sizes = [8, 8], strides = [1, 1]} : vector<8x32xf32> to vector<8x8xf32>
    %170 = vector.extract_strided_slice %139 {offsets = [0, 16], sizes = [8, 8], strides = [1, 1]} : vector<8x32xf32> to vector<8x8xf32>
    %171 = vector.extract_strided_slice %140 {offsets = [0, 16], sizes = [8, 8], strides = [1, 1]} : vector<8x32xf32> to vector<8x8xf32>
    %cst_64 = arith.constant dense<0.000000e+00> : vector<8x8xf32>
    %172 = tpu.matmul %169, %170, %cst_64 {dimension_numbers = #tpu.dot_dimension_numbers<[1], [1], [0], [0], [0, 0, 1, 0], [], []>} : vector<8x8xf32>, vector<8x8xf32>, vector<8x8xf32> -> vector<8x8xf32>
    %cst_65 = arith.constant dense<0xFF800000> : vector<8xf32>
    %173 = vector.multi_reduction <maximumf>, %172, %cst_65 [1] : vector<8x8xf32> to vector<8xf32>
    %174 = vector.shape_cast %173 : vector<8xf32> to vector<8x1xf32>
    %175 = vector.broadcast %174 : vector<8x1xf32> to vector<8x8xf32>
    %176 = arith.subf %172, %175 : vector<8x8xf32>
    %177 = math.exp %176 : vector<8x8xf32>
    %cst_66 = arith.constant dense<0.000000e+00> : vector<8xf32>
    %178 = vector.multi_reduction <add>, %177, %cst_66 [1] : vector<8x8xf32> to vector<8xf32>
    %179 = vector.shape_cast %178 : vector<8xf32> to vector<8x1xf32>
    %180 = vector.broadcast %179 : vector<8x1xf32> to vector<8x8xf32>
    %181 = arith.divf %177, %180 : vector<8x8xf32>
    %cst_67 = arith.constant dense<0.000000e+00> : vector<8x8xf32>
    %182 = tpu.matmul %181, %171, %cst_67 {dimension_numbers = #tpu.dot_dimension_numbers<[1], [0], [0], [1], [0, 0, 1, 1], [], []>} : vector<8x8xf32>, vector<8x8xf32>, vector<8x8xf32> -> vector<8x8xf32>
    %183 = vector.extract_strided_slice %138 {offsets = [0, 24], sizes = [8, 8], strides = [1, 1]} : vector<8x32xf32> to vector<8x8xf32>
    %184 = vector.extract_strided_slice %139 {offsets = [0, 24], sizes = [8, 8], strides = [1, 1]} : vector<8x32xf32> to vector<8x8xf32>
    %185 = vector.extract_strided_slice %140 {offsets = [0, 24], sizes = [8, 8], strides = [1, 1]} : vector<8x32xf32> to vector<8x8xf32>
    %cst_68 = arith.constant dense<0.000000e+00> : vector<8x8xf32>
    %186 = tpu.matmul %183, %184, %cst_68 {dimension_numbers = #tpu.dot_dimension_numbers<[1], [1], [0], [0], [0, 0, 1, 0], [], []>} : vector<8x8xf32>, vector<8x8xf32>, vector<8x8xf32> -> vector<8x8xf32>
    %cst_69 = arith.constant dense<0xFF800000> : vector<8xf32>
    %187 = vector.multi_reduction <maximumf>, %186, %cst_69 [1] : vector<8x8xf32> to vector<8xf32>
    %188 = vector.shape_cast %187 : vector<8xf32> to vector<8x1xf32>
    %189 = vector.broadcast %188 : vector<8x1xf32> to vector<8x8xf32>
    %190 = arith.subf %186, %189 : vector<8x8xf32>
    %191 = math.exp %190 : vector<8x8xf32>
    %cst_70 = arith.constant dense<0.000000e+00> : vector<8xf32>
    %192 = vector.multi_reduction <add>, %191, %cst_70 [1] : vector<8x8xf32> to vector<8xf32>
    %193 = vector.shape_cast %192 : vector<8xf32> to vector<8x1xf32>
    %194 = vector.broadcast %193 : vector<8x1xf32> to vector<8x8xf32>
    %195 = arith.divf %191, %194 : vector<8x8xf32>
    %cst_71 = arith.constant dense<0.000000e+00> : vector<8x8xf32>
    %196 = tpu.matmul %195, %185, %cst_71 {dimension_numbers = #tpu.dot_dimension_numbers<[1], [0], [0], [1], [0, 0, 1, 1], [], []>} : vector<8x8xf32>, vector<8x8xf32>, vector<8x8xf32> -> vector<8x8xf32>
    %197 = tpu.concatenate %154, %168, %182, %196 in 1 : vector<8x8xf32>, vector<8x8xf32>, vector<8x8xf32>, vector<8x8xf32> -> vector<8x32xf32>
    %cst_72 = arith.constant dense<0.000000e+00> : vector<8x32xf32>
    %198 = tpu.matmul %197, %1, %cst_72 {dimension_numbers = #tpu.dot_dimension_numbers<[1], [0], [0], [1], [0, 0, 1, 1], [], []>} : vector<8x32xf32>, vector<32x32xf32>, vector<8x32xf32> -> vector<8x32xf32>
    %199 = vector.broadcast %6 : vector<1x32xf32> to vector<8x32xf32>
    %200 = arith.addf %198, %199 : vector<8x32xf32>
    %201 = arith.addf %134, %200 : vector<8x32xf32>
    %cst_73 = arith.constant dense<0.000000e+00> : vector<8xf32>
    %202 = vector.multi_reduction <add>, %201, %cst_73 [1] : vector<8x32xf32> to vector<8xf32>
    %203 = vector.shape_cast %202 : vector<8xf32> to vector<8x1xf32>
    %cst_74 = arith.constant 3.200000e+01 : f32
    %204 = vector.broadcast %cst_74 : f32 to vector<8x1xf32>
    %205 = arith.divf %203, %204 : vector<8x1xf32>
    %206 = vector.broadcast %205 : vector<8x1xf32> to vector<8x32xf32>
    %207 = arith.subf %201, %206 : vector<8x32xf32>
    %208 = arith.mulf %207, %207 : vector<8x32xf32>
    %cst_75 = arith.constant dense<0.000000e+00> : vector<8xf32>
    %209 = vector.multi_reduction <add>, %208, %cst_75 [1] : vector<8x32xf32> to vector<8xf32>
    %210 = vector.shape_cast %209 : vector<8xf32> to vector<8x1xf32>
    %cst_76 = arith.constant 3.200000e+01 : f32
    %211 = vector.broadcast %cst_76 : f32 to vector<8x1xf32>
    %212 = arith.divf %210, %211 : vector<8x1xf32>
    %cst_77 = arith.constant 9.99999974E-6 : f32
    %213 = vector.broadcast %cst_77 : f32 to vector<8x1xf32>
    %214 = arith.addf %212, %213 : vector<8x1xf32>
    %215 = math.rsqrt %214 : vector<8x1xf32>
    %216 = vector.broadcast %215 : vector<8x1xf32> to vector<8x32xf32>
    %217 = arith.mulf %207, %216 : vector<8x32xf32>
    %218 = vector.broadcast %8 : vector<1x32xf32> to vector<8x32xf32>
    %219 = arith.mulf %217, %218 : vector<8x32xf32>
    %220 = vector.broadcast %9 : vector<1x32xf32> to vector<8x32xf32>
    %221 = arith.addf %219, %220 : vector<8x32xf32>
    %cst_78 = arith.constant dense<0.000000e+00> : vector<8x64xf32>
    %222 = tpu.matmul %221, %2, %cst_78 {dimension_numbers = #tpu.dot_dimension_numbers<[1], [0], [0], [1], [0, 0, 1, 1], [], []>} : vector<8x32xf32>, vector<32x64xf32>, vector<8x64xf32> -> vector<8x64xf32>
    %223 = vector.broadcast %5 : vector<1x64xf32> to vector<8x64xf32>
    %224 = arith.addf %222, %223 : vector<8x64xf32>
    %cst_79 = arith.constant 0.000000e+00 : f32
    %225 = vector.broadcast %cst_79 : f32 to vector<8x64xf32>
    %226 = arith.maximumf %224, %225 : vector<8x64xf32>
    %cst_80 = arith.constant dense<0.000000e+00> : vector<8x32xf32>
    %227 = tpu.matmul %226, %3, %cst_80 {dimension_numbers = #tpu.dot_dimension_numbers<[1], [0], [0], [1], [0, 0, 1, 1], [], []>} : vector<8x64xf32>, vector<64x32xf32>, vector<8x32xf32> -> vector<8x32xf32>
    %228 = vector.broadcast %7 : vector<1x32xf32> to vector<8x32xf32>
    %229 = arith.addf %227, %228 : vector<8x32xf32>
    %230 = arith.addf %221, %229 : vector<8x32xf32>
    %cst_81 = arith.constant dense<0.000000e+00> : vector<8xf32>
    %231 = vector.multi_reduction <add>, %230, %cst_81 [1] : vector<8x32xf32> to vector<8xf32>
    %232 = vector.shape_cast %231 : vector<8xf32> to vector<8x1xf32>
    %cst_82 = arith.constant 3.200000e+01 : f32
    %233 = vector.broadcast %cst_82 : f32 to vector<8x1xf32>
    %234 = arith.divf %232, %233 : vector<8x1xf32>
    %235 = vector.broadcast %234 : vector<8x1xf32> to vector<8x32xf32>
    %236 = arith.subf %230, %235 : vector<8x32xf32>
    %237 = arith.mulf %236, %236 : vector<8x32xf32>
    %cst_83 = arith.constant dense<0.000000e+00> : vector<8xf32>
    %238 = vector.multi_reduction <add>, %237, %cst_83 [1] : vector<8x32xf32> to vector<8xf32>
    %239 = vector.shape_cast %238 : vector<8xf32> to vector<8x1xf32>
    %cst_84 = arith.constant 3.200000e+01 : f32
    %240 = vector.broadcast %cst_84 : f32 to vector<8x1xf32>
    %241 = arith.divf %239, %240 : vector<8x1xf32>
    %cst_85 = arith.constant 9.99999974E-6 : f32
    %242 = vector.broadcast %cst_85 : f32 to vector<8x1xf32>
    %243 = arith.addf %241, %242 : vector<8x1xf32>
    %244 = math.rsqrt %243 : vector<8x1xf32>
    %245 = vector.broadcast %244 : vector<8x1xf32> to vector<8x32xf32>
    %246 = arith.mulf %236, %245 : vector<8x32xf32>
    %247 = vector.broadcast %10 : vector<1x32xf32> to vector<8x32xf32>
    %248 = arith.mulf %246, %247 : vector<8x32xf32>
    %249 = vector.broadcast %11 : vector<1x32xf32> to vector<8x32xf32>
    %250 = arith.addf %248, %249 : vector<8x32xf32>
    %c0_86 = arith.constant 0 : index
    %c1_87 = arith.constant 1 : index
    %c0_88 = arith.constant 0 : index
    %251 = vector.load %arg6[%c0_86, %c1_87, %c0_88] : memref<8x2x32xf32, #tpu.memory_space<vmem>>, vector<8x1x32xf32>
    %252 = vector.shape_cast %251 : vector<8x1x32xf32> to vector<8x32xf32>
    %253 = vector.shape_cast %250 : vector<8x32xf32> to vector<8x1x32xf32>
    tpu.vector_store %arg6[%c0_86, %c1_87, %c0_88], %253 {strides = array<i32>} : memref<8x2x32xf32, #tpu.memory_space<vmem>>, vector<8x1x32xf32>,
    return
  }
}

</mosaic_0001>

<bundles_post_ra>
// kernel: encoder_layer_forward.1
= control target key start
LH: loop header
LB: loop body
LE: loop exit
PB: predicated region body
PF: predicated region fallthrough
CT: control target
= control target key end

     0   :  { %11 = vsyncpa [#allocation3], 0  ;;  %s4135_s0 = inlined_call_operand.hbm [shape: f32[8,2,32], index: 0, kind: input, shape index: {}]   ;;  %s4136_s1 = inlined_call_operand.vmem [shape: f32[32,96], index: 1, kind: input, shape index: {}]   ;;  %s4137_s2 = inlined_call_operand.vmem [shape: f32[32,32], index: 2, kind: input, shape index: {}]   ;;  %s4138_s3 = inlined_call_operand.vmem [shape: f32[32,64], index: 3, kind: input, shape index: {}]   ;;  %s4139_s4 = inlined_call_operand.vmem [shape: f32[64,32], index: 4, kind: input, shape index: {}]   ;;  %s4140_s5 = inlined_call_operand.hbm [shape: f32[8,96], index: 5, kind: input, shape index: {}]   ;;  %s4141_s6 = inlined_call_operand.hbm [shape: f32[8,2,32], index: 6, kind: output, shape index: {}]  }
   0x1   :  { %12 = vsyncpa [#allocation6], 0 }
   0x2   :  { %13 = vsyncpa [#allocation4], 0  ;;  %s3231_s21 = smov [#allocation2]  }
   0x3   :  { %s19_s22 = sshll.u32 %s3231_s21, 4  ;;  %s20_s22 = int_to_ptr.vmem [resolvable:$true] %s19_s22 }
   0x4   :  { %s3173_s23 = scalar_lea.vmem %s20_s22, 256  ;;  %p3178_p1 = scmp.lt.s32.totalorder %s20_s22, %s20_s22 }
   0x5   :  { %p3174_p0 = scmp.ne.s32.totalorder %s20_s22, %s3173_s23  ;;  %p3179_p2 = scmp.lt.s32.totalorder %s3173_s23, %s3173_s23 }
   0x7   :  { %p3180_p3 = por %p3179_p2, %p3178_p1 }
   0x9   :  { %p3181_p4 = pnand %p3180_p3, %p3174_p0 }
   0xb   :  { %3184 = shalt.err (!%p3181_p4)
}
   0xc   :  { %s3232_s24 = smov 32   ;;  %s3233_s25 = smov 2  }
   0xd   :  { %25 = dma.hbm_to_vmem [thread:$0]  %s4135_s0, 256, %s20_s22, [#allocation3], %s3232_s24, %s3232_s24, %s3233_s25  }
   0xe   :  { %s3234_s28 = smov [#allocation5]  }
   0xf   :  { %s40_s29 = sshll.u32 %s3234_s28, 4  ;;  %s41_s29 = int_to_ptr.vmem [resolvable:$true] %s40_s29 }
  0x10   :  { %s3193_s30 = scalar_lea.vmem %s41_s29, 128  ;;  %p3198_p6 = scmp.lt.s32.totalorder %s41_s29, %s41_s29 }
  0x11   :  { %p3194_p5 = scmp.ne.s32.totalorder %s41_s29, %s3193_s30  ;;  %p3199_p7 = scmp.lt.s32.totalorder %s3193_s30, %s3193_s30 }
  0x13   :  { %p3200_p8 = por %p3199_p7, %p3198_p6 }
  0x15   :  { %p3201_p9 = pnand %p3200_p8, %p3194_p5 }
  0x17   :  { %3204 = shalt.err (!%p3201_p9)
}
  0x18   :  { %43 = dma.hbm_to_vmem [thread:$0]  %s4140_s5, 128, %s41_s29, [#allocation6]  }
  0x19   :  { %3225 = dma.done.wait [#allocation3], 256  }
  0x1a   :  { %3226 = vsyncadd [#allocation3], 4294967040 }
  0x1b   :  { %3227 = dma.done.wait [#allocation6], 128  }
  0x1c   :  { %3228 = vsyncadd [#allocation6], 4294967168  ;;  %v3235_v0 = vmov 0.0   ;;  %vm3236_vm0 = vmmov 0   ;;  %v3305_v1 = vld [vmem:[%s4136_s1 + $0x18] sm:$0xff]  ;;  %v3310_v2 = vld [vmem:[%s4136_s1 + $0x10] sm:$0xff] }
  0x1d   :  { %2920 = vmatprep.subr.mxu1 %v3235_v0  ;;  %2928 = vmatprep.mubr.msk.f32.mxu1 %vm3236_vm0, %v3235_v0  ;;  %v3316_v3 = vld [vmem:[%s4136_s1 + $0x8] sm:$0xff]  ;;  %v3318_v4 = vld [vmem:[#allocation2 + $0x2] sm:$0x1]  ;;  %v3321_v5 = vld [vmem:[#allocation2 + $0x4] sm:$0x1]  ;;  %vm99_vm1 = vcmask 1041409  }
  0x1e   :  { %2941 = vmatprep.subr.mxu0 %v3235_v0  ;;  %2943 = vmatprep.mubr.msk.f32.mxu0 %vm3236_vm0, %v3235_v0  ;;  %v3323_v6 = vld [vmem:[#allocation2 + $0x6] sm:$0x1]  ;;  %v3325_v7 = vld [vmem:[#allocation2 + $0x8] sm:$0x1]  ;;  %v3328_v8 = vld [vmem:[#allocation2] sm:$0x1] }
  0x1f   :  { %2921 = vmatpush3.msra.mxu1 %v3305_v1  ;;  %v3330_v9 = vld [vmem:[#allocation2 + $0xa] sm:$0x1]  ;;  %vm102_vm2 = vcmask 1042434   ;;  %v3336_v10 = vld [vmem:[%s4136_s1] sm:$0xff]  ;;  %v3338_v11 = vld [vmem:[#allocation2 + $0xc] sm:$0x1] }
  0x20   :  { %2922 = vmatprep.subr.mxu1 %v3235_v0  ;;  %v98_v12 = vrot.slane %v3318_v4, 7  ;;  %v101_v13 = vrot.slane %v3321_v5, 6  ;;  %v104_v14 = vrot.slane %v3323_v6, 5  ;;  %v3344_v15 = vld [vmem:[#allocation2 + $0xe] sm:$0x1]  ;;  %vm105_vm3 = vcmask 1043459  }
  0x21   :  { %2923 = vmatpush3.msra.mxu1 %v3310_v2  ;;  %v107_v16 = vrot.slane %v3325_v7, 4  ;;  %vm108_vm4 = vcmask 1044484   ;;  %v110_v18 = vrot.slane %v3330_v9, 3  ;;  %vm111_vm5 = vcmask 1045509   ;;  %v3364_v27 = vld [vmem:[#allocation5] ss:$0 sm:$0xff] }
  0x22   :  { %2924 = vmatprep.subr.mxu1 %v3235_v0  ;;  %v100_v17 = vsel %vm99_vm1, %v98_v12, %v3328_v8  ;;  %v113_v20 = vrot.slane %v3338_v11, 2  ;;  %vm114_vm6 = vcmask 1046534   ;;  %v116_v22 = vrot.slane %v3344_v15, 1  ;;  %s3237_s1 = smov 120   ;;  %s3238_s15 = smov 96  }
  0x23   :  { %2925 = vmatpush3.msra.mxu1 %v3316_v3  ;;  %v103_v19 = vsel %vm102_vm2, %v101_v13, %v100_v17  ;;  %vm117_vm7 = vcmask 1047559   ;;  %vm119_vm8 = vcmask 261120   ;;  %s3239_s16 = smov 80   ;;  %s3240_s17 = smov 88   ;;  %vm195_vm9 = vcmask 64512  }
  0x24   :  { %2926 = vmatprep.subr.mxu1 %v3235_v0  ;;  %v106_v21 = vsel %vm105_vm3, %v104_v14, %v103_v19  ;;  %s3241_s18 = smov 72   ;;  %s3242_s19 = smov 112   ;;  %vm865_vm10 = vcmask 130048   ;;  %vm867_vm11 = vcmask 195584   ;;  %vm1210_vm12 = vcmask 523264  }
  0x25   :  { %2927 = vmatpush3.msra.mxu1 %v3336_v10  ;;  %v109_v23 = vsel %vm108_vm4, %v107_v16, %v106_v21  ;;  %s3243_s20 = smov 104   ;;  %s3244_s21 = smov 56   ;;  %vm1444_vm13 = vcmask 253952  }
  0x26   :  { %2931 = vmatprep.subr.mxu1 %v3235_v0  ;;  %v112_v24 = vsel %vm111_vm5, %v110_v18, %v109_v23  ;;  %s3245_s22 = smov 64   ;;  %s3246_s23 = smov 48  }
  0x27   :  { %v115_v25 = vsel %vm114_vm6, %v113_v20, %v112_v24  ;;  %s3247_s26 = smov 40   ;;  %s3248_s29 = smov 8  }
  0x28   :  { %v118_v26 = vsel %vm117_vm7, %v116_v22, %v115_v25  ;;  %s3249_s10 = smov 16   ;;  %s3250_s11 = smov 24  }
  0x29   :  { %2929 = vmatmul.mubr.msk.f32.vlgmr.msra.gmra.mxu1 %vm119_vm8, %v118_v26 }
  0x2a   :  { %2933 = vmatprep.mubr.msk.f32.mxu1 %vm3236_vm0, %v3235_v0 }
  0xe9   :  { %v188_v28 = vpop.f32.mrf.mxu1 }
  0xea   :  { %v3367_v29 = vadd.f32 %v3364_v27, %v188_v28 }
  0xeb   :  { %v2930_v30 = vpop.f32.mrf.mxu1 }
  0xec   :  { %357 = vrot.lane.b32.xlu1 %v3367_v29, %s3237_s1  ;;  %193 = vrot.lane.b32.xlu0 %v3367_v29, %s3238_s15 }
  0xf0   :  { %524 = vrot.lane.b32.xlu1 %v3367_v29, %s3239_s16  ;;  %359 = vrot.lane.b32.xlu0 %v3367_v29, %s3240_s17 }
  0xf4   :  { %689 = vrot.lane.b32.xlu1 %v3367_v29, %s3241_s18  ;;  %522 = vrot.lane.b32.xlu0 %v3367_v29, %s3242_s19 }
  0xf8   :  { %687 = vrot.lane.b32.xlu0 %v3367_v29, %s3243_s20 }
 0x15e   :  { %v358_v31 = vpop.permute.xlu1 %357  ;;  %v194_v32 = vpop.permute.xlu0 %193 }
 0x15f   :  { %2932 = vmatpush3.xpose.msk.msra.mxu1 %vm195_vm9, %v194_v32 }
 0x160   :  { %2936 = vmatprep.subr.mxu1 %v3235_v0 }
 0x162   :  { %2934 = vmatmul.mubr.msk.f32.vlgmr.msra.gmra.mxu1 %vm195_vm9, %v3367_v29  ;;  %v360_v33 = vpop.permute.xlu0 %359  ;;  %v525_v34 = vpop.permute.xlu1 %524 }
 0x163   :  { %2942 = vmatpush3.xpose.msk.msra.mxu0 %vm195_vm9, %v360_v33  ;;  %2938 = vmatprep.mubr.msk.f32.mxu1 %vm3236_vm0, %v3235_v0 }
 0x164   :  { %2951 = vmatprep.subr.mxu0 %v3235_v0 }
 0x166   :  { %2944 = vmatmul.mubr.msk.f32.vlgmr.msra.gmra.mxu0 %vm195_vm9, %v358_v31  ;;  %v523_v35 = vpop.permute.xlu0 %522  ;;  %v690_v36 = vpop.permute.xlu1 %689 }
 0x167   :  { %2952 = vmatpush3.xpose.msk.msra.mxu0 %vm195_vm9, %v525_v34  ;;  %2953 = vmatprep.mubr.msk.f32.mxu0 %vm3236_vm0, %v3235_v0 }
 0x168   :  { %2961 = vmatprep.subr.mxu0 %v3235_v0 }
 0x16a   :  { %2954 = vmatmul.mubr.msk.f32.vlgmr.msra.gmra.mxu0 %vm195_vm9, %v523_v35  ;;  %v688_v37 = vpop.permute.xlu0 %687 }
 0x16b   :  { %2962 = vmatpush3.xpose.msk.msra.mxu0 %vm195_vm9, %v690_v36  ;;  %2963 = vmatprep.mubr.msk.f32.mxu0 %vm3236_vm0, %v3235_v0  ;;  %v3439_v36 = vld [vmem:[%s4137_s2 + $0x18] sm:$0xff] }
 0x16c   :  { %2971 = vmatprep.subr.mxu0 %v3235_v0 }
 0x16e   :  { %2964 = vmatmul.mubr.msk.f32.vlgmr.msra.gmra.mxu0 %vm195_vm9, %v688_v37 }
 0x16f   :  { %2979 = vmatprep.mubr.msk.f32.mxu0 %vm3236_vm0, %v3235_v0  ;;  %2972 = vmatpush3.msra.mxu0 %v3439_v36 }
 0x170   :  { %2973 = vmatprep.subr.mxu0 %v3235_v0 }
 0x222   :  { %v266_v38 = vpop.f32.mrf.mxu1 }
 0x223   :  { %v270_v39 = vsel %vm195_vm9, %v266_v38, -inf }
 0x224   :  { %271 = vmax.xlane.f32.xlu1 %v270_v39  ;;  %v2935_v40 = vpop.f32.mrf.mxu1 }
 0x226   :  { %v431_v41 = vpop.f32.mrf.mxu0 }
 0x227   :  { %v435_v42 = vsel %vm195_vm9, %v431_v41, -inf }
 0x228   :  { %436 = vmax.xlane.f32.xlu0 %v435_v42  ;;  %v2945_v43 = vpop.f32.mrf.mxu0  ;;  %v3452_v42 = vld [vmem:[%s4137_s2 + $0x8] sm:$0xff] }
 0x229   :  { %v3461_v43 = vld [vmem:[%s4137_s2] sm:$0xff] }
 0x22a   :  { %v596_v44 = vpop.f32.mrf.mxu0 }
 0x22b   :  { %v600_v45 = vsel %vm195_vm9, %v596_v44, -inf }
 0x22c   :  { %601 = vmax.xlane.f32.xlu0 %v600_v45  ;;  %v2955_v46 = vpop.f32.mrf.mxu0 }
 0x22e   :  { %v761_v47 = vpop.f32.mrf.mxu0 }
 0x22f   :  { %v765_v48 = vsel %vm195_vm9, %v761_v47, -inf }
 0x230   :  { %v2965_v49 = vpop.f32.mrf.mxu0  ;;  %766 = vmax.xlane.f32.xlu1 %v765_v48 }
 0x241   :  { %446 = vrot.lane.b32.xlu1 %v3367_v29, %s3244_s21 }
 0x2ad   :  { %v272_v50 = vpop.xlane.xlu1 %271 }
 0x2ae   :  { %v273_v51 = vsub.f32 %v266_v38, %v272_v50 }
 0x2b0   :  { %v274_v52 = vmul.f32 1.442695, %v273_v51 }
 0x2b1   :  { %v437_v53 = vpop.xlane.xlu0 %436 }
 0x2b2   :  { %3125 = vpow2.f32 %v274_v52  ;;  %v438_v54 = vsub.f32 %v431_v41, %v437_v53  ;;  %v3447_v41 = vld [vmem:[%s4137_s2 + $0x10] sm:$0xff] }
 0x2b3   :  { %2974 = vmatpush3.msra.mxu0 %v3447_v41 }
 0x2b4   :  { %v439_v55 = vmul.f32 1.442695, %v438_v54  ;;  %2975 = vmatprep.subr.mxu0 %v3235_v0  ;;  %v3473_v54 = vld [vmem:[#allocation5 + $0x2] ss:$0 sm:$0xff] }
 0x2b5   :  { %v602_v13 = vpop.xlane.xlu0 %601  ;;  %2976 = vmatpush3.msra.mxu0 %v3452_v42 }
 0x2b6   :  { %3127 = vpow2.f32 %v439_v55  ;;  %v603_v14 = vsub.f32 %v596_v44, %v602_v13  ;;  %2977 = vmatprep.subr.mxu0 %v3235_v0 }
 0x2b7   :  { %2978 = vmatpush3.msra.mxu0 %v3461_v43 }
 0x2b8   :  { %v604_v16 = vmul.f32 1.442695, %v603_v14  ;;  %2993 = vmatprep.subr.mxu0 %v3235_v0 }
 0x2b9   :  { %v767_v56 = vpop.xlane.xlu1 %766 }
 0x2ba   :  { %v768_v57 = vsub.f32 %v761_v47, %v767_v56 }
 0x2bc   :  { %v769_v58 = vmul.f32 1.442695, %v768_v57 }
 0x2bd   :  { %v447_v19 = vpop.permute.xlu1 %446 }
 0x2be   :  { %3129 = vpow2.f32 %v769_v58 }
 0x2bf   :  { %v3126_v59 = vpop.eup %3125  ;;  %3131 = vpow2.f32 %v604_v16 }
 0x2c0   :  { %v276_v60 = vsel %vm195_vm9, %v3126_v59, 0.0 }
 0x2c1   :  { %277 = vadd.xlane.f32.xlu0 %v276_v60 }
 0x2c3   :  { %v3128_v61 = vpop.eup %3127 }
 0x2c4   :  { %v441_v62 = vsel %vm195_vm9, %v3128_v61, 0.0 }
 0x2c5   :  { %442 = vadd.xlane.f32.xlu1 %v441_v62 }
 0x2cb   :  { %v3130_v63 = vpop.eup %3129 }
 0x2cc   :  { %v771_v12 = vsel %vm195_vm9, %v3130_v63, 0.0  ;;  %v3132_v17 = vpop.eup %3131 }
 0x2cd   :  { %772 = vadd.xlane.f32.xlu1 %v771_v12  ;;  %v606_v18 = vsel %vm195_vm9, %v3132_v17, 0.0 }
 0x2d7   :  { %281 = vrot.lane.b32.xlu0 %v3367_v29, %s3245_s22 }
 0x2de   :  { %611 = vrot.lane.b32.xlu1 %v3367_v29, %s3246_s23 }
 0x2f6   :  { %607 = vadd.xlane.f32.xlu0 %v606_v18 }
 0x30c   :  { %776 = vrot.lane.b32.xlu0 %v3367_v29, %s3247_s26 }
 0x34a   :  { %v278_v20 = vpop.xlane.xlu0 %277 }
 0x34b   :  { %3133 = vrcp.f32 %v278_v20 }
 0x34e   :  { %v282_v21 = vpop.permute.xlu0 %281  ;;  %v443_v22 = vpop.xlane.xlu1 %442 }
 0x34f   :  { %3135 = vrcp.f32 %v443_v22  ;;  %2937 = vmatpush3.msra.mxu1 %v282_v21 }
 0x350   :  { %2946 = vmatprep.subr.mxu1 %v3235_v0 }
 0x356   :  { %v773_v24 = vpop.xlane.xlu1 %772 }
 0x358   :  { %v3134_v23 = vpop.eup %3133 }
 0x359   :  { %v280_v25 = vmul.f32 %v3134_v23, %v3126_v59 }
 0x35a   :  { %v612_v29 = vpop.permute.xlu1 %611 }
 0x35b   :  { %2939 = vmatmul.mubr.msk.f32.vlgmr.msra.gmra.mxu1 %vm195_vm9, %v280_v25 }
 0x35c   :  { %v3136_v26 = vpop.eup %3135  ;;  %2947 = vmatpush3.msra.mxu1 %v447_v19  ;;  %2948 = vmatprep.mubr.msk.f32.mxu1 %vm3236_vm0, %v3235_v0 }
 0x35d   :  { %2956 = vmatprep.subr.mxu1 %v3235_v0  ;;  %v445_v28 = vmul.f32 %v3136_v26, %v3128_v61 }
 0x35f   :  { %2949 = vmatmul.mubr.msk.f32.vlgmr.msra.gmra.mxu1 %vm195_vm9, %v445_v28 }
 0x360   :  { %2957 = vmatpush3.msra.mxu1 %v612_v29  ;;  %2958 = vmatprep.mubr.msk.f32.mxu1 %vm3236_vm0, %v3235_v0 }
 0x361   :  { %2966 = vmatprep.subr.mxu1 %v3235_v0 }
 0x37f   :  { %v608_v30 = vpop.xlane.xlu0 %607 }
 0x380   :  { %3137 = vrcp.f32 %v608_v30 }
 0x381   :  { %3139 = vrcp.f32 %v773_v24 }
 0x383   :  { %v777_v34 = vpop.permute.xlu0 %776 }
 0x38d   :  { %v3138_v31 = vpop.eup %3137 }
 0x38e   :  { %v610_v32 = vmul.f32 %v3138_v31, %v3132_v17  ;;  %v3140_v33 = vpop.eup %3139 }
 0x38f   :  { %v775_v35 = vmul.f32 %v3140_v33, %v3130_v63 }
 0x390   :  { %2959 = vmatmul.mubr.msk.f32.vlgmr.msra.gmra.mxu1 %vm195_vm9, %v610_v32 }
 0x391   :  { %2967 = vmatpush3.msra.mxu1 %v777_v34  ;;  %2968 = vmatprep.mubr.msk.f32.mxu1 %vm3236_vm0, %v3235_v0 }
 0x392   :  { %2982 = vmatprep.subr.mxu1 %v3235_v0 }
 0x394   :  { %2969 = vmatmul.mubr.msk.f32.vlgmr.msra.gmra.mxu1 %vm195_vm9, %v775_v35 }
 0x395   :  { %2990 = vmatprep.mubr.msk.f32.mxu1 %vm3236_vm0, %v3235_v0 }
 0x41b   :  { %v353_v37 = vpop.f32.mrf.mxu1 }
 0x41d   :  { %v2940_v38 = vpop.f32.mrf.mxu1 }
 0x41f   :  { %v518_v39 = vpop.f32.mrf.mxu1 }
 0x420   :  { %853 = vrot.lane.b32.xlu1 %v518_v39, %s3248_s29 }
 0x421   :  { %v2950_v40 = vpop.f32.mrf.mxu1 }
 0x450   :  { %v683_v44 = vpop.f32.mrf.mxu1 }
 0x451   :  { %857 = vrot.lane.b32.xlu0 %v683_v44, %s3249_s10 }
 0x452   :  { %v2960_v45 = vpop.f32.mrf.mxu1 }
 0x454   :  { %v848_v46 = vpop.f32.mrf.mxu1 }
 0x455   :  { %861 = vrot.lane.b32.xlu1 %v848_v46, %s3250_s11 }
 0x456   :  { %v2970_v47 = vpop.f32.mrf.mxu1 }
 0x492   :  { %v854_v48 = vpop.permute.xlu1 %853 }
 0x493   :  { %v864_v50 = vsel %vm195_vm9, %v353_v37, %v854_v48 }
 0x4c3   :  { %v858_v49 = vpop.permute.xlu0 %857 }
 0x4c4   :  { %v866_v51 = vsel %vm865_vm10, %v864_v50, %v858_v49 }
 0x4c7   :  { %v862_v52 = vpop.permute.xlu1 %861 }
 0x4c8   :  { %v868_v53 = vsel %vm867_vm11, %v866_v51, %v862_v52 }
 0x4c9   :  { %2980 = vmatmul.mubr.msk.f32.vlgmr.msra.gmra.mxu0 %vm119_vm8, %v868_v53 }
 0x4ca   :  { %3009 = vmatprep.mubr.msk.f32.mxu0 %vm3236_vm0, %v3235_v0 }
 0x589   :  { %v942_v55 = vpop.f32.mrf.mxu0 }
 0x58a   :  { %v943_v56 = vadd.f32 %v3473_v54, %v942_v55 }
 0x58b   :  { %v2981_v57 = vpop.f32.mrf.mxu0 }
 0x58c   :  { %v947_v58 = vrot.slane %v943_v56, 1  ;;  %v948_v59 = vrot.slane %v943_v56, 2  ;;  %v949_v60 = vrot.slane %v943_v56, 3  ;;  %v950_v61 = vrot.slane %v943_v56, 4 }
 0x58d   :  { %v951_v62 = vrot.slane %v943_v56, 5  ;;  %v952_v63 = vrot.slane %v943_v56, 6  ;;  %v953_v12 = vrot.slane %v943_v56, 7  ;;  %v962_v18 = vadd.f32 %v943_v56, %v3328_v8 }
 0x58e   :  { %v963_v13 = vadd.f32 %v947_v58, %v3318_v4  ;;  %v964_v14 = vadd.f32 %v948_v59, %v3321_v5  ;;  %v965_v16 = vadd.f32 %v949_v60, %v3323_v6  ;;  %v966_v17 = vadd.f32 %v950_v61, %v3325_v7 }
 0x58f   :  { %v967_v19 = vadd.f32 %v951_v62, %v3330_v9  ;;  %v968_v22 = vadd.f32 %v952_v63, %v3338_v11  ;;  %v969_v23 = vadd.f32 %v953_v12, %v3344_v15 }
 0x590   :  { %v978_v20 = vrot.slane %v963_v13, 7  ;;  %v980_v21 = vrot.slane %v964_v14, 6  ;;  %v982_v25 = vrot.slane %v965_v16, 5  ;;  %v984_v5 = vrot.slane %v966_v17, 4 }
 0x591   :  { %v986_v26 = vrot.slane %v967_v19, 3  ;;  %v988_v8 = vrot.slane %v968_v22, 2  ;;  %v990_v28 = vrot.slane %v969_v23, 1 }
 0x592   :  { %v979_v24 = vsel %vm99_vm1, %v978_v20, %v962_v18 }
 0x593   :  { %v981_v4 = vsel %vm102_vm2, %v980_v21, %v979_v24  ;;  %v3535_v24 = vld [vmem:[%s4138_s3 + $0x18] sm:$0xff] }
 0x594   :  { %v983_v6 = vsel %vm105_vm3, %v982_v25, %v981_v4  ;;  %v3540_v25 = vld [vmem:[%s4138_s3 + $0x10] sm:$0xff]  ;;  %2983 = vmatpush3.msra.mxu1 %v3535_v24  ;;  %v3547_v4 = vld [vmem:[%s4138_s3 + $0x8] sm:$0xff] }
 0x595   :  { %v985_v7 = vsel %vm108_vm4, %v984_v5, %v983_v6  ;;  %2984 = vmatprep.subr.mxu1 %v3235_v0  ;;  %v3554_v5 = vld [vmem:[%s4138_s3] sm:$0xff]  ;;  %v3563_v6 = vld [vmem:[%s4139_s4 + $0x38] sm:$0xff] }
 0x596   :  { %v987_v9 = vsel %vm111_vm5, %v986_v26, %v985_v7  ;;  %2985 = vmatpush3.msra.mxu1 %v3540_v25  ;;  %v3568_v26 = vld [vmem:[%s4139_s4 + $0x30] sm:$0xff]  ;;  %2994 = vmatpush3.msra.mxu0 %v3563_v6  ;;  %v3575_v7 = vld [vmem:[%s4139_s4 + $0x28] sm:$0xff] }
 0x597   :  { %v989_v29 = vsel %vm114_vm6, %v988_v8, %v987_v9  ;;  %2986 = vmatprep.subr.mxu1 %v3235_v0  ;;  %2995 = vmatprep.subr.mxu0 %v3235_v0  ;;  %v3582_v8 = vld [vmem:[%s4139_s4 + $0x20] sm:$0xff]  ;;  %v3589_v9 = vld [vmem:[%s4139_s4 + $0x18] sm:$0xff] }
 0x598   :  { %v991_v11 = vsel %vm117_vm7, %v990_v28, %v989_v29  ;;  %2987 = vmatpush3.msra.mxu1 %v3547_v4  ;;  %2996 = vmatpush3.msra.mxu0 %v3568_v26 }
 0x599   :  { %v993_v15 = vsel %vm119_vm8, %v991_v11, 0.0  ;;  %2988 = vmatprep.subr.mxu1 %v3235_v0  ;;  %2997 = vmatprep.subr.mxu0 %v3235_v0 }
 0x59a   :  { %994 = vadd.xlane.f32.xlu0 %v993_v15  ;;  %2989 = vmatpush3.msra.mxu1 %v3554_v5  ;;  %v3595_v15 = vld [vmem:[#allocation2 + $0x3] sm:$0x1] }
 0x59b   :  { %3012 = vmatprep.subr.mxu1 %v3235_v0  ;;  %2998 = vmatpush3.msra.mxu0 %v3575_v7 }
 0x59c   :  { %2999 = vmatprep.subr.mxu0 %v3235_v0 }
 0x59d   :  { %3000 = vmatpush3.msra.mxu0 %v3582_v8 }
 0x59e   :  { %3001 = vmatprep.subr.mxu0 %v3235_v0 }
 0x59f   :  { %3002 = vmatpush3.msra.mxu0 %v3589_v9 }
 0x5a0   :  { %3003 = vmatprep.subr.mxu0 %v3235_v0 }
 0x623   :  { %v995_v30 = vpop.xlane.xlu0 %994 }
 0x624   :  { %v997_v31 = vmul.f32 0.03125, %v995_v30  ;;  %v1469_v30 = vrot.slane %v3595_v15, 7 }
 0x626   :  { %v999_v32 = vrot.slane %v997_v31, 1  ;;  %v1000_v33 = vrot.slane %v997_v31, 2  ;;  %v1001_v34 = vrot.slane %v997_v31, 3  ;;  %v1002_v35 = vrot.slane %v997_v31, 4 }
 0x627   :  { %v1003_v37 = vrot.slane %v997_v31, 5  ;;  %v1004_v38 = vrot.slane %v997_v31, 6  ;;  %v1005_v39 = vrot.slane %v997_v31, 7  ;;  %v3492_v40 = vsub.f32 %v962_v18, %v997_v31  ;;  %v3598_v31 = vld [vmem:[#allocation2 + $0x1] sm:$0x1] }
 0x628   :  { %v3494_v44 = vsub.f32 %v963_v13, %v999_v32  ;;  %v3496_v45 = vsub.f32 %v964_v14, %v1000_v33  ;;  %v3498_v46 = vsub.f32 %v965_v16, %v1001_v34  ;;  %v3500_v47 = vsub.f32 %v966_v17, %v1002_v35  ;;  %v3600_v32 = vld [vmem:[#allocation2 + $0x5] sm:$0x1] }
 0x629   :  { %v3502_v48 = vsub.f32 %v967_v19, %v1003_v37  ;;  %v3504_v49 = vsub.f32 %v968_v22, %v1004_v38  ;;  %v3506_v50 = vsub.f32 %v969_v23, %v1005_v39  ;;  %v1022_v56 = vmul.f32 %v3492_v40, %v3492_v40  ;;  %v3605_v37 = vld [vmem:[#allocation5 + $0x4] ss:$0 sm:$0xff] }
 0x62a   :  { %v1023_v51 = vmul.f32 %v3494_v44, %v3494_v44  ;;  %v1024_v52 = vmul.f32 %v3496_v45, %v3496_v45  ;;  %v1025_v53 = vmul.f32 %v3498_v46, %v3498_v46  ;;  %v1026_v55 = vmul.f32 %v3500_v47, %v3500_v47 }
 0x62b   :  { %v1027_v57 = vmul.f32 %v3502_v48, %v3502_v48  ;;  %v1028_v60 = vmul.f32 %v3504_v49, %v3504_v49  ;;  %v1029_v61 = vmul.f32 %v3506_v50, %v3506_v50  ;;  %v1470_v34 = vsel %vm99_vm1, %v1469_v30, %v3598_v31 }
 0x62c   :  { %v1038_v58 = vrot.slane %v1023_v51, 7  ;;  %v1040_v59 = vrot.slane %v1024_v52, 6  ;;  %v1042_v63 = vrot.slane %v1025_v53, 5  ;;  %v1044_v13 = vrot.slane %v1026_v55, 4 }
 0x62d   :  { %v1046_v16 = vrot.slane %v1027_v57, 3  ;;  %v1048_v18 = vrot.slane %v1028_v60, 2  ;;  %v1050_v20 = vrot.slane %v1029_v61, 1  ;;  %v1471_v35 = vrot.slane %v3600_v32, 6 }
 0x62e   :  { %v1039_v62 = vsel %vm99_vm1, %v1038_v58, %v1022_v56 }
 0x62f   :  { %v1041_v12 = vsel %vm102_vm2, %v1040_v59, %v1039_v62  ;;  %v3612_v62 = vld [vmem:[#allocation2 + $0x7] sm:$0x1] }
 0x630   :  { %v1043_v14 = vsel %vm105_vm3, %v1042_v63, %v1041_v12 }
 0x631   :  { %v1045_v17 = vsel %vm108_vm4, %v1044_v13, %v1043_v14 }
 0x632   :  { %v1047_v19 = vsel %vm111_vm5, %v1046_v16, %v1045_v17  ;;  %v3622_v16 = vld [vmem:[#allocation5 + $0x5] ss:$0 sm:$0xff] }
 0x633   :  { %v1049_v21 = vsel %vm114_vm6, %v1048_v18, %v1047_v19 }
 0x634   :  { %v1051_v22 = vsel %vm117_vm7, %v1050_v20, %v1049_v21  ;;  %v3637_v20 = vld [vmem:[#allocation2 + $0x9] sm:$0x1] }
 0x635   :  { %v1053_v23 = vsel %vm119_vm8, %v1051_v22, 0.0  ;;  %v1472_v22 = vsel %vm102_vm2, %v1471_v35, %v1470_v34 }
 0x636   :  { %1054 = vadd.xlane.f32.xlu1 %v1053_v23 }
 0x6bf   :  { %v1055_v28 = vpop.xlane.xlu1 %1054 }
 0x6c0   :  { %v1056_v29 = vmul.f32 0.03125, %v1055_v28 }
 0x6c2   :  { %v1057_v11 = vadd.f32 1e-05, %v1056_v29 }
 0x6c4   :  { %3141 = vrsqrt.f32 %v1057_v11 }
 0x6d1   :  { %v3142_v33 = vpop.eup %3141 }
 0x6d2   :  { %v1060_v38 = vrot.slane %v3142_v33, 1  ;;  %v1061_v39 = vrot.slane %v3142_v33, 2  ;;  %v1062_v51 = vrot.slane %v3142_v33, 3  ;;  %v1063_v52 = vrot.slane %v3142_v33, 4 }
 0x6d3   :  { %v1064_v53 = vrot.slane %v3142_v33, 5  ;;  %v1065_v55 = vrot.slane %v3142_v33, 6  ;;  %v1066_v56 = vrot.slane %v3142_v33, 7  ;;  %v1075_v57 = vmul.f32 %v3142_v33, %v3492_v40  ;;  %v3654_v33 = vld [vmem:[#allocation2 + $0xb] sm:$0x1] }
 0x6d4   :  { %v1076_v58 = vmul.f32 %v1060_v38, %v3494_v44  ;;  %v1077_v59 = vmul.f32 %v1061_v39, %v3496_v45  ;;  %v1078_v60 = vmul.f32 %v1062_v51, %v3498_v46  ;;  %v1079_v61 = vmul.f32 %v1063_v52, %v3500_v47 }
 0x6d5   :  { %v1080_v63 = vmul.f32 %v1064_v53, %v3502_v48  ;;  %v1081_v12 = vmul.f32 %v1065_v55, %v3504_v49  ;;  %v1082_v13 = vmul.f32 %v1066_v56, %v3506_v50  ;;  %v1087_v14 = vmul.f32 %v3605_v37, %v1075_v57  ;;  %v3668_v57 = vld [vmem:[#allocation2 + $0xd] sm:$0x1] }
 0x6d6   :  { %v1088_v40 = vmul.f32 %v3605_v37, %v1076_v58  ;;  %v1089_v44 = vmul.f32 %v3605_v37, %v1077_v59  ;;  %v1090_v45 = vmul.f32 %v3605_v37, %v1078_v60  ;;  %v1091_v46 = vmul.f32 %v3605_v37, %v1079_v61 }
 0x6d7   :  { %v1092_v47 = vmul.f32 %v3605_v37, %v1080_v63  ;;  %v1093_v48 = vmul.f32 %v3605_v37, %v1081_v12  ;;  %v1473_v49 = vrot.slane %v3612_v62, 5  ;;  %v1094_v50 = vmul.f32 %v3605_v37, %v1082_v13 }
 0x6d8   :  { %v3629_v17 = vadd.f32 %v3622_v16, %v1088_v40  ;;  %v3632_v18 = vadd.f32 %v3622_v16, %v1089_v44  ;;  %v3635_v19 = vadd.f32 %v3622_v16, %v1090_v45  ;;  %v3640_v21 = vadd.f32 %v3622_v16, %v1091_v46 }
 0x6d9   :  { %v3644_v23 = vadd.f32 %v3622_v16, %v1087_v14  ;;  %v3647_v28 = vadd.f32 %v3622_v16, %v1092_v47  ;;  %v3652_v30 = vadd.f32 %v3622_v16, %v1093_v48  ;;  %v1475_v38 = vrot.slane %v3637_v20, 4  ;;  %v3677_v14 = vld [vmem:[#allocation2 + $0xf] sm:$0x1] }
 0x6da   :  { %v1119_v29 = vrot.slane %v3629_v17, 7  ;;  %v1121_v11 = vrot.slane %v3632_v18, 6  ;;  %v3658_v39 = vadd.f32 %v3622_v16, %v1094_v50  ;;  %v1123_v35 = vrot.slane %v3635_v19, 5 }
 0x6db   :  { %v1474_v51 = vsel %vm105_vm3, %v1473_v49, %v1472_v22  ;;  %v1125_v53 = vrot.slane %v3640_v21, 4  ;;  %v1127_v56 = vrot.slane %v3647_v28, 3  ;;  %v1477_v58 = vrot.slane %v3654_v33, 3 }
 0x6dc   :  { %v1120_v34 = vsel %vm99_vm1, %v1119_v29, %v3644_v23  ;;  %v1129_v60 = vrot.slane %v3652_v30, 2  ;;  %v1476_v61 = vsel %vm108_vm4, %v1475_v38, %v1474_v51  ;;  %v1131_v12 = vrot.slane %v3658_v39, 1 }
 0x6dd   :  { %v1122_v52 = vsel %vm102_vm2, %v1121_v11, %v1120_v34  ;;  %v1479_v40 = vrot.slane %v3668_v57, 2  ;;  %v1478_v45 = vsel %vm111_vm5, %v1477_v58, %v1476_v61  ;;  %v1481_v46 = vrot.slane %v3677_v14, 1 }
 0x6de   :  { %v1124_v55 = vsel %vm105_vm3, %v1123_v35, %v1122_v52 }
 0x6df   :  { %v1126_v59 = vsel %vm108_vm4, %v1125_v53, %v1124_v55  ;;  %v1480_v47 = vsel %vm114_vm6, %v1479_v40, %v1478_v45 }
 0x6e0   :  { %v1128_v63 = vsel %vm111_vm5, %v1127_v56, %v1126_v59  ;;  %v1482_v48 = vsel %vm117_vm7, %v1481_v46, %v1480_v47 }
 0x6e1   :  { %v1130_v13 = vsel %vm114_vm6, %v1129_v60, %v1128_v63 }
 0x6e2   :  { %v1132_v44 = vsel %vm117_vm7, %v1131_v12, %v1130_v13 }
 0x6e3   :  { %2991 = vmatmul.mubr.msk.f32.vlgmr.msra.gmra.mxu1 %vm119_vm8, %v1132_v44 }
 0x6e4   :  { %3013 = vmatpush3.msra.mxu1 %v3305_v1  ;;  %3020 = vmatprep.mubr.msk.f32.mxu1 %vm3236_vm0, %v3235_v0  ;;  %v3702_v1 = vld [vmem:[%s4139_s4 + $0x10] sm:$0xff] }
 0x6e5   :  { %3014 = vmatprep.subr.mxu1 %v3235_v0  ;;  %3004 = vmatpush3.msra.mxu0 %v3702_v1 }
 0x6e6   :  { %3015 = vmatpush3.msra.mxu1 %v3310_v2  ;;  %3005 = vmatprep.subr.mxu0 %v3235_v0  ;;  %v3709_v2 = vld [vmem:[%s4139_s4 + $0x8] sm:$0xff] }
 0x6e7   :  { %3016 = vmatprep.subr.mxu1 %v3235_v0  ;;  %3006 = vmatpush3.msra.mxu0 %v3709_v2 }
 0x6e8   :  { %3017 = vmatpush3.msra.mxu1 %v3316_v3  ;;  %v3715_v3 = vld [vmem:[%s4139_s4] sm:$0xff]  ;;  %3007 = vmatprep.subr.mxu0 %v3235_v0  ;;  %s3251_s4 = smov [#allocation7]  }
 0x6e9   :  { %3018 = vmatprep.subr.mxu1 %v3235_v0  ;;  %3008 = vmatpush3.msra.mxu0 %v3715_v3 }
 0x6ea   :  { %3019 = vmatpush3.msra.mxu1 %v3336_v10  ;;  %3033 = vmatprep.subr.mxu0 %v3235_v0  ;;  %v3720_v10 = vld [vmem:[#allocation5 + $0x1] ss:$0 sm:$0xff] }
 0x6eb   :  { %3021 = vmatmul.mubr.msk.f32.vlgmr.msra.gmra.mxu1 %vm119_vm8, %v1482_v48  ;;  %3023 = vmatprep.subr.mxu1 %v3235_v0 }
 0x6ec   :  { %3025 = vmatprep.mubr.msk.f32.mxu1 %vm3236_vm0, %v3235_v0 }
 0x7a3   :  { %v1201_v49 = vpop.f32.mrf.mxu1 }
 0x7a4   :  { %v1202_v50 = vadd.f32 %v3720_v10, %v1201_v49 }
 0x7a5   :  { %v2992_v22 = vpop.f32.mrf.mxu1 }
 0x7a6   :  { %v1205_v29 = vmax.f32 %v1202_v50, 0.0 }
 0x7a8   :  { %3010 = vmatmul.mubr.msk.f32.vlgmr.msra.gmra.mxu0 %vm1210_vm12, %v1205_v29 }
 0x7a9   :  { %3035 = vmatprep.mubr.msk.f32.mxu0 %vm3236_vm0, %v3235_v0 }
 0x7ab   :  { %v1551_v11 = vpop.f32.mrf.mxu1 }
 0x7ac   :  { %v3727_v38 = vadd.f32 %v3364_v27, %v1551_v11 }
 0x7ad   :  { %v3022_v34 = vpop.f32.mrf.mxu1 }
 0x7ae   :  { %1721 = vrot.lane.b32.xlu1 %v3727_v38, %s3240_s17  ;;  %1556 = vrot.lane.b32.xlu0 %v3727_v38, %s3238_s15 }
 0x7b2   :  { %1886 = vrot.lane.b32.xlu1 %v3727_v38, %s3239_s16  ;;  %1719 = vrot.lane.b32.xlu0 %v3727_v38, %s3237_s1  ;;  %s2787_s1 = sshll.u32 %s3251_s4, 4  ;;  %s2788_s1 = int_to_ptr.vmem [resolvable:$true] %s2787_s1 }
 0x7b3   :  { %s3205_s15 = scalar_lea.vmem %s2788_s1, 256  ;;  %p3210_p11 = scmp.lt.s32.totalorder %s2788_s1, %s2788_s1 }
 0x7b4   :  { %p3206_p10 = scmp.ne.s32.totalorder %s2788_s1, %s3205_s15  ;;  %p3211_p12 = scmp.lt.s32.totalorder %s3205_s15, %s3205_s15 }
 0x7b6   :  { %2051 = vrot.lane.b32.xlu1 %v3727_v38, %s3241_s18  ;;  %1884 = vrot.lane.b32.xlu0 %v3727_v38, %s3242_s19  ;;  %p3212_p13 = por %p3211_p12, %p3210_p11 }
 0x7b8   :  { %p3213_p0 = pnand %p3212_p13, %p3206_p10 }
 0x7ba   :  { %2049 = vrot.lane.b32.xlu0 %v3727_v38, %s3243_s20 }
 0x820   :  { %v1722_v27 = vpop.permute.xlu1 %1721  ;;  %v1557_v35 = vpop.permute.xlu0 %1556 }
 0x821   :  { %3024 = vmatpush3.xpose.msk.msra.mxu1 %vm195_vm9, %v1557_v35  ;;  %3034 = vmatpush3.xpose.msk.msra.mxu0 %vm195_vm9, %v1722_v27 }
 0x822   :  { %3043 = vmatprep.subr.mxu0 %v3235_v0  ;;  %3028 = vmatprep.subr.mxu1 %v3235_v0 }
 0x824   :  { %v1887_v51 = vpop.permute.xlu1 %1886  ;;  %3026 = vmatmul.mubr.msk.f32.vlgmr.msra.gmra.mxu1 %vm195_vm9, %v3727_v38  ;;  %v1720_v52 = vpop.permute.xlu0 %1719 }
 0x825   :  { %3036 = vmatmul.mubr.msk.f32.vlgmr.msra.gmra.mxu0 %vm195_vm9, %v1720_v52  ;;  %3030 = vmatprep.mubr.msk.f32.mxu1 %vm3236_vm0, %v3235_v0 }
 0x826   :  { %3044 = vmatpush3.xpose.msk.msra.mxu0 %vm195_vm9, %v1887_v51  ;;  %3045 = vmatprep.mubr.msk.f32.mxu0 %vm3236_vm0, %v3235_v0 }
 0x827   :  { %3053 = vmatprep.subr.mxu0 %v3235_v0 }
 0x828   :  { %v2052_v53 = vpop.permute.xlu1 %2051  ;;  %v1885_v55 = vpop.permute.xlu0 %1884 }
 0x829   :  { %3046 = vmatmul.mubr.msk.f32.vlgmr.msra.gmra.mxu0 %vm195_vm9, %v1885_v55 }
 0x82a   :  { %3054 = vmatpush3.xpose.msk.msra.mxu0 %vm195_vm9, %v2052_v53  ;;  %3055 = vmatprep.mubr.msk.f32.mxu0 %vm3236_vm0, %v3235_v0 }
 0x82b   :  { %3063 = vmatprep.subr.mxu0 %v3235_v0 }
 0x82c   :  { %v2050_v56 = vpop.permute.xlu0 %2049 }
 0x82d   :  { %3056 = vmatmul.mubr.msk.f32.vlgmr.msra.gmra.mxu0 %vm195_vm9, %v2050_v56 }
 0x82e   :  { %3064 = vmatpush3.msra.mxu0 %v3439_v36  ;;  %3071 = vmatprep.mubr.msk.f32.mxu0 %vm3236_vm0, %v3235_v0 }
 0x82f   :  { %3065 = vmatprep.subr.mxu0 %v3235_v0 }
 0x830   :  { %3066 = vmatpush3.msra.mxu0 %v3447_v41 }
 0x831   :  { %3067 = vmatprep.subr.mxu0 %v3235_v0 }
 0x832   :  { %3068 = vmatpush3.msra.mxu0 %v3452_v42 }
 0x833   :  { %3069 = vmatprep.subr.mxu0 %v3235_v0 }
 0x834   :  { %3070 = vmatpush3.msra.mxu0 %v3461_v43 }
 0x835   :  { %3085 = vmatprep.subr.mxu0 %v3235_v0 }
 0x868   :  { %v3772_v58 = vpop.f32.mrf.mxu0 }
 0x86a   :  { %v3011_v36 = vpop.f32.mrf.mxu0 }
 0x8e4   :  { %v1628_v59 = vpop.f32.mrf.mxu1 }
 0x8e5   :  { %v1793_v60 = vpop.f32.mrf.mxu0  ;;  %v1632_v61 = vsel %vm195_vm9, %v1628_v59, -inf }
 0x8e6   :  { %1633 = vmax.xlane.f32.xlu1 %v1632_v61  ;;  %v3027_v63 = vpop.f32.mrf.mxu1  ;;  %v1797_v41 = vsel %vm195_vm9, %v1793_v60, -inf }
 0x8e7   :  { %1798 = vmax.xlane.f32.xlu0 %v1797_v41  ;;  %v3037_v12 = vpop.f32.mrf.mxu0 }
 0x8e9   :  { %v1958_v42 = vpop.f32.mrf.mxu0 }
 0x8ea   :  { %v1962_v13 = vsel %vm195_vm9, %v1958_v42, -inf }
 0x8eb   :  { %1963 = vmax.xlane.f32.xlu0 %v1962_v13  ;;  %v3047_v43 = vpop.f32.mrf.mxu0 }
 0x8ed   :  { %v2123_v40 = vpop.f32.mrf.mxu0 }
 0x8ee   :  { %v2127_v44 = vsel %vm195_vm9, %v2123_v40, -inf }
 0x8ef   :  { %v3057_v45 = vpop.f32.mrf.mxu0  ;;  %2128 = vmax.xlane.f32.xlu1 %v2127_v44 }
 0x900   :  { %1808 = vrot.lane.b32.xlu1 %v3727_v38, %s3244_s21 }
 0x96f   :  { %v1634_v46 = vpop.xlane.xlu1 %1633 }
 0x970   :  { %v1635_v47 = vsub.f32 %v1628_v59, %v1634_v46  ;;  %v1799_v48 = vpop.xlane.xlu0 %1798 }
 0x971   :  { %v1800_v49 = vsub.f32 %v1793_v60, %v1799_v48 }
 0x972   :  { %v1636_v50 = vmul.f32 1.442695, %v1635_v47 }
 0x973   :  { %v1801_v22 = vmul.f32 1.442695, %v1800_v49 }
 0x974   :  { %3143 = vpow2.f32 %v1636_v50  ;;  %v1964_v56 = vpop.xlane.xlu0 %1963 }
 0x975   :  { %3145 = vpow2.f32 %v1801_v22  ;;  %v1965_v36 = vsub.f32 %v1958_v42, %v1964_v56 }
 0x977   :  { %v1966_v59 = vmul.f32 1.442695, %v1965_v36 }
 0x978   :  { %v2129_v29 = vpop.xlane.xlu1 %2128 }
 0x979   :  { %v2130_v11 = vsub.f32 %v2123_v40, %v2129_v29 }
 0x97b   :  { %v2131_v34 = vmul.f32 1.442695, %v2130_v11 }
 0x97c   :  { %v1809_v63 = vpop.permute.xlu1 %1808 }
 0x97d   :  { %3147 = vpow2.f32 %v2131_v34 }
 0x97e   :  { %3149 = vpow2.f32 %v1966_v59 }
 0x981   :  { %v3144_v27 = vpop.eup %3143 }
 0x982   :  { %v3146_v35 = vpop.eup %3145  ;;  %v1638_v51 = vsel %vm195_vm9, %v3144_v27, 0.0 }
 0x983   :  { %1639 = vadd.xlane.f32.xlu0 %v1638_v51  ;;  %v1803_v52 = vsel %vm195_vm9, %v3146_v35, 0.0 }
 0x984   :  { %1804 = vadd.xlane.f32.xlu1 %v1803_v52 }
 0x98a   :  { %v3148_v53 = vpop.eup %3147 }
 0x98b   :  { %v2133_v55 = vsel %vm195_vm9, %v3148_v53, 0.0  ;;  %v3150_v60 = vpop.eup %3149 }
 0x98c   :  { %2134 = vadd.xlane.f32.xlu1 %v2133_v55  ;;  %v1968_v61 = vsel %vm195_vm9, %v3150_v60, 0.0 }
 0x999   :  { %1643 = vrot.lane.b32.xlu0 %v3727_v38, %s3245_s22 }
 0x99d   :  { %1973 = vrot.lane.b32.xlu1 %v3727_v38, %s3246_s23 }
 0x9b8   :  { %1969 = vadd.xlane.f32.xlu0 %v1968_v61 }
 0x9ce   :  { %2138 = vrot.lane.b32.xlu0 %v3727_v38, %s3247_s26 }
 0xa0c   :  { %v1640_v41 = vpop.xlane.xlu0 %1639 }
 0xa0d   :  { %3151 = vrcp.f32 %v1640_v41  ;;  %v1805_v12 = vpop.xlane.xlu1 %1804 }
 0xa0e   :  { %3153 = vrcp.f32 %v1805_v12 }
 0xa10   :  { %v1644_v13 = vpop.permute.xlu0 %1643 }
 0xa11   :  { %3029 = vmatpush3.msra.mxu1 %v1644_v13 }
 0xa12   :  { %3038 = vmatprep.subr.mxu1 %v3235_v0 }
 0xa15   :  { %v2135_v42 = vpop.xlane.xlu1 %2134 }
 0xa19   :  { %v1974_v45 = vpop.permute.xlu1 %1973 }
 0xa1a   :  { %v3152_v43 = vpop.eup %3151 }
 0xa1b   :  { %v1642_v40 = vmul.f32 %v3152_v43, %v3144_v27  ;;  %v3154_v44 = vpop.eup %3153 }
 0xa1c   :  { %v1807_v38 = vmul.f32 %v3154_v44, %v3146_v35 }
 0xa1d   :  { %3031 = vmatmul.mubr.msk.f32.vlgmr.msra.gmra.mxu1 %vm195_vm9, %v1642_v40 }
 0xa1e   :  { %3039 = vmatpush3.msra.mxu1 %v1809_v63  ;;  %3040 = vmatprep.mubr.msk.f32.mxu1 %vm3236_vm0, %v3235_v0 }
 0xa1f   :  { %3048 = vmatprep.subr.mxu1 %v3235_v0 }
 0xa21   :  { %3041 = vmatmul.mubr.msk.f32.vlgmr.msra.gmra.mxu1 %vm195_vm9, %v1807_v38 }
 0xa22   :  { %3049 = vmatpush3.msra.mxu1 %v1974_v45  ;;  %3050 = vmatprep.mubr.msk.f32.mxu1 %vm3236_vm0, %v3235_v0 }
 0xa23   :  { %3058 = vmatprep.subr.mxu1 %v3235_v0 }
 0xa41   :  { %v1970_v46 = vpop.xlane.xlu0 %1969 }
 0xa42   :  { %3155 = vrcp.f32 %v1970_v46 }
 0xa43   :  { %3157 = vrcp.f32 %v2135_v42 }
 0xa45   :  { %v2139_v50 = vpop.permute.xlu0 %2138 }
 0xa4f   :  { %v3156_v47 = vpop.eup %3155 }
 0xa50   :  { %v1972_v48 = vmul.f32 %v3156_v47, %v3150_v60  ;;  %v3158_v49 = vpop.eup %3157 }
 0xa51   :  { %v2137_v22 = vmul.f32 %v3158_v49, %v3148_v53 }
 0xa52   :  { %3051 = vmatmul.mubr.msk.f32.vlgmr.msra.gmra.mxu1 %vm195_vm9, %v1972_v48 }
 0xa53   :  { %3059 = vmatpush3.msra.mxu1 %v2139_v50  ;;  %3060 = vmatprep.mubr.msk.f32.mxu1 %vm3236_vm0, %v3235_v0 }
 0xa54   :  { %3074 = vmatprep.subr.mxu1 %v3235_v0 }
 0xa56   :  { %3061 = vmatmul.mubr.msk.f32.vlgmr.msra.gmra.mxu1 %vm195_vm9, %v2137_v22 }
 0xa57   :  { %3075 = vmatpush3.msra.mxu1 %v3535_v24  ;;  %3082 = vmatprep.mubr.msk.f32.mxu1 %vm3236_vm0, %v3235_v0 }
 0xa58   :  { %3076 = vmatprep.subr.mxu1 %v3235_v0 }
 0xa59   :  { %3077 = vmatpush3.msra.mxu1 %v3540_v25 }
 0xa5a   :  { %3078 = vmatprep.subr.mxu1 %v3235_v0 }
 0xa5b   :  { %3079 = vmatpush3.msra.mxu1 %v3547_v4 }
 0xa5c   :  { %3080 = vmatprep.subr.mxu1 %v3235_v0 }
 0xa5d   :  { %3081 = vmatpush3.msra.mxu1 %v3554_v5 }
 0xadd   :  { %v1715_v29 = vpop.f32.mrf.mxu1 }
 0xadf   :  { %v3032_v11 = vpop.f32.mrf.mxu1 }
 0xae1   :  { %v1880_v34 = vpop.f32.mrf.mxu1 }
 0xae2   :  { %2215 = vrot.lane.b32.xlu1 %v1880_v34, %s3248_s29 }
 0xae3   :  { %v3042_v24 = vpop.f32.mrf.mxu1 }
 0xb12   :  { %v2045_v27 = vpop.f32.mrf.mxu1 }
 0xb13   :  { %2219 = vrot.lane.b32.xlu0 %v2045_v27, %s3249_s10 }
 0xb14   :  { %v3052_v35 = vpop.f32.mrf.mxu1 }
 0xb16   :  { %v2210_v51 = vpop.f32.mrf.mxu1 }
 0xb17   :  { %2223 = vrot.lane.b32.xlu1 %v2210_v51, %s3250_s11 }
 0xb18   :  { %v3062_v25 = vpop.f32.mrf.mxu1 }
 0xb54   :  { %v2216_v52 = vpop.permute.xlu1 %2215 }
 0xb55   :  { %v2226_v53 = vsel %vm195_vm9, %v1715_v29, %v2216_v52 }
 0xb85   :  { %v2220_v4 = vpop.permute.xlu0 %2219 }
 0xb86   :  { %v2227_v5 = vsel %vm865_vm10, %v2226_v53, %v2220_v4 }
 0xb89   :  { %v2224_v55 = vpop.permute.xlu1 %2223 }
 0xb8a   :  { %v2228_v56 = vsel %vm867_vm11, %v2227_v5, %v2224_v55 }
 0xb8b   :  { %3072 = vmatmul.mubr.msk.f32.vlgmr.msra.gmra.mxu0 %vm119_vm8, %v2228_v56 }
 0xb8c   :  { %3086 = vmatpush3.msra.mxu0 %v3563_v6  ;;  %3101 = vmatprep.mubr.msk.f32.mxu0 %vm3236_vm0, %v3235_v0  ;;  %v3837_v6 = vld [vmem:[#allocation5 + $0x3] ss:$0 sm:$0xff] }
 0xb8d   :  { %3087 = vmatprep.subr.mxu0 %v3235_v0 }
 0xb8e   :  { %3088 = vmatpush3.msra.mxu0 %v3568_v26  ;;  %v1281_v26 = vadd.f32 %v3837_v6, %v3772_v58 }
 0xb8f   :  { %3089 = vmatprep.subr.mxu0 %v3235_v0 }
 0xb90   :  { %3090 = vmatpush3.msra.mxu0 %v3575_v7  ;;  %v1285_v7 = vrot.slane %v1281_v26, 1  ;;  %v1287_v36 = vrot.slane %v1281_v26, 3  ;;  %v1288_v59 = vrot.slane %v1281_v26, 4  ;;  %v1289_v61 = vrot.slane %v1281_v26, 5 }
 0xb91   :  { %3091 = vmatprep.subr.mxu0 %v3235_v0  ;;  %v1290_v12 = vrot.slane %v1281_v26, 6  ;;  %v1291_v50 = vrot.slane %v1281_v26, 7 }
 0xb92   :  { %3092 = vmatpush3.msra.mxu0 %v3582_v8  ;;  %v1286_v8 = vrot.slane %v1281_v26, 2  ;;  %v3853_v60 = vadd.f32 %v1287_v36, %v3635_v19  ;;  %v3864_v45 = vadd.f32 %v1289_v61, %v3647_v28 }
 0xb93   :  { %3093 = vmatprep.subr.mxu0 %v3235_v0  ;;  %v3876_v27 = vadd.f32 %v1290_v12, %v3652_v30 }
 0xb94   :  { %3094 = vmatpush3.msra.mxu0 %v3589_v9  ;;  %v3842_v9 = vadd.f32 %v1285_v7, %v3629_v17  ;;  %v1320_v13 = vrot.slane %v3853_v60, 5  ;;  %v1324_v35 = vrot.slane %v3864_v45, 3 }
 0xb95   :  { %3095 = vmatprep.subr.mxu0 %v3235_v0 }
 0xb96   :  { %3096 = vmatpush3.msra.mxu0 %v3702_v1  ;;  %v3845_v1 = vadd.f32 %v1286_v8, %v3632_v18 }
 0xb97   :  { %3097 = vmatprep.subr.mxu0 %v3235_v0 }
 0xb98   :  { %3098 = vmatpush3.msra.mxu0 %v3709_v2  ;;  %v1316_v2 = vrot.slane %v3842_v9, 7 }
 0xb99   :  { %3099 = vmatprep.subr.mxu0 %v3235_v0  ;;  %v3849_v0 = vadd.f32 %v1281_v26, %v3644_v23  ;;  %v3860_v23 = vadd.f32 %v1288_v59, %v3640_v21 }
 0xb9a   :  { %3100 = vmatpush3.msra.mxu0 %v3715_v3  ;;  %v1318_v3 = vrot.slane %v3845_v1, 6 }
 0xb9b   :  { %v1317_v58 = vsel %vm99_vm1, %v1316_v2, %v3849_v0  ;;  %v1322_v22 = vrot.slane %v3860_v23, 4 }
 0xb9c   :  { %v1319_v63 = vsel %vm102_vm2, %v1318_v3, %v1317_v58 }
 0xc4b   :  { %v2298_v17 = vpop.f32.mrf.mxu0 }
 0xc4c   :  { %v2299_v18 = vadd.f32 %v3473_v54, %v2298_v17  ;;  %v1321_v54 = vsel %vm105_vm3, %v1320_v13, %v1319_v63 }
 0xc4d   :  { %v3073_v41 = vpop.f32.mrf.mxu0 }
 0xc4e   :  { %v2303_v43 = vrot.slane %v2299_v18, 1  ;;  %v2304_v42 = vrot.slane %v2299_v18, 2  ;;  %v2305_v19 = vrot.slane %v2299_v18, 3  ;;  %v2306_v40 = vrot.slane %v2299_v18, 4 }
 0xc4f   :  { %v2307_v44 = vrot.slane %v2299_v18, 5  ;;  %v2308_v38 = vrot.slane %v2299_v18, 6  ;;  %v2309_v46 = vrot.slane %v2299_v18, 7  ;;  %v2318_v29 = vadd.f32 %v2299_v18, %v3598_v31 }
 0xc50   :  { %v2319_v47 = vadd.f32 %v2303_v43, %v3595_v15  ;;  %v2320_v48 = vadd.f32 %v2304_v42, %v3600_v32  ;;  %v2321_v21 = vadd.f32 %v2305_v19, %v3612_v62  ;;  %v2322_v49 = vadd.f32 %v2306_v40, %v3637_v20 }
 0xc51   :  { %v2323_v11 = vadd.f32 %v2307_v44, %v3654_v33  ;;  %v2324_v24 = vadd.f32 %v2308_v38, %v3668_v57  ;;  %v1323_v15 = vsel %vm108_vm4, %v1322_v22, %v1321_v54  ;;  %v2325_v32 = vadd.f32 %v2309_v46, %v3677_v14 }
 0xc52   :  { %v2334_v28 = vrot.slane %v2319_v47, 7  ;;  %v2336_v34 = vrot.slane %v2320_v48, 6  ;;  %v2338_v20 = vrot.slane %v2321_v21, 5  ;;  %v2340_v51 = vrot.slane %v2322_v49, 4 }
 0xc53   :  { %v2342_v25 = vrot.slane %v2323_v11, 3  ;;  %v3885_v57 = vadd.f32 %v1291_v50, %v3658_v39  ;;  %v1325_v30 = vsel %vm111_vm5, %v1324_v35, %v1323_v15  ;;  %v2344_v4 = vrot.slane %v2324_v24, 2 }
 0xc54   :  { %v2335_v62 = vsel %vm99_vm1, %v2334_v28, %v2318_v29  ;;  %v1326_v14 = vrot.slane %v3876_v27, 2  ;;  %v2346_v5 = vrot.slane %v2325_v32, 1 }
 0xc55   :  { %v2337_v31 = vsel %vm102_vm2, %v2336_v34, %v2335_v62  ;;  %v1328_v7 = vrot.slane %v3885_v57, 1 }
 0xc56   :  { %v2339_v33 = vsel %vm105_vm3, %v2338_v20, %v2337_v31  ;;  %v1327_v56 = vsel %vm114_vm6, %v1326_v14, %v1325_v30 }
 0xc57   :  { %v2341_v52 = vsel %vm108_vm4, %v2340_v51, %v2339_v33  ;;  %v1329_v8 = vsel %vm117_vm7, %v1328_v7, %v1327_v56 }
 0xc58   :  { %v2343_v53 = vsel %vm111_vm5, %v2342_v25, %v2341_v52  ;;  %v1331_v36 = vsel %vm119_vm8, %v1329_v8, 0.0 }
 0xc59   :  { %v2345_v55 = vsel %vm114_vm6, %v2344_v4, %v2343_v53 }
 0xc5a   :  { %v2347_v26 = vsel %vm117_vm7, %v2346_v5, %v2345_v55 }
 0xc5b   :  { %v2349_v39 = vsel %vm119_vm8, %v2347_v26, 0.0 }
 0xc5c   :  { %2350 = vadd.xlane.f32.xlu0 %v2349_v39 }
 0xc60   :  { %1332 = vadd.xlane.f32.xlu0 %v1331_v36 }
 0xce5   :  { %v2351_v2 = vpop.xlane.xlu0 %2350 }
 0xce6   :  { %v2352_v3 = vmul.f32 0.03125, %v2351_v2 }
 0xce8   :  { %v2354_v59 = vrot.slane %v2352_v3, 1  ;;  %v2355_v58 = vrot.slane %v2352_v3, 2  ;;  %v2356_v17 = vrot.slane %v2352_v3, 3  ;;  %v2357_v61 = vrot.slane %v2352_v3, 4 }
 0xce9   :  { %v1333_v18 = vpop.xlane.xlu0 %1332  ;;  %v2358_v63 = vrot.slane %v2352_v3, 5  ;;  %v2359_v41 = vrot.slane %v2352_v3, 6  ;;  %v2360_v12 = vrot.slane %v2352_v3, 7  ;;  %v3898_v13 = vsub.f32 %v2318_v29, %v2352_v3 }
 0xcea   :  { %v1334_v43 = vmul.f32 0.03125, %v1333_v18  ;;  %v3900_v42 = vsub.f32 %v2319_v47, %v2354_v59  ;;  %v3902_v19 = vsub.f32 %v2320_v48, %v2355_v58  ;;  %v3904_v40 = vsub.f32 %v2321_v21, %v2356_v17 }
 0xceb   :  { %v3906_v44 = vsub.f32 %v2322_v49, %v2357_v61  ;;  %v3908_v38 = vsub.f32 %v2323_v11, %v2358_v63  ;;  %v3910_v54 = vsub.f32 %v2324_v24, %v2359_v41  ;;  %v3912_v46 = vsub.f32 %v2325_v32, %v2360_v12 }
 0xcec   :  { %v2378_v50 = vmul.f32 %v3900_v42, %v3900_v42  ;;  %v2379_v22 = vmul.f32 %v3902_v19, %v3902_v19  ;;  %v2380_v47 = vmul.f32 %v3904_v40, %v3904_v40  ;;  %v2377_v48 = vmul.f32 %v3898_v13, %v3898_v13 }
 0xced   :  { %v2381_v21 = vmul.f32 %v3906_v44, %v3906_v44  ;;  %v2382_v49 = vmul.f32 %v3908_v38, %v3908_v38  ;;  %v2383_v29 = vmul.f32 %v3910_v54, %v3910_v54  ;;  %v2384_v11 = vmul.f32 %v3912_v46, %v3912_v46 }
 0xcee   :  { %v2393_v28 = vrot.slane %v2378_v50, 7  ;;  %v2395_v34 = vrot.slane %v2379_v22, 6  ;;  %v1336_v24 = vrot.slane %v1334_v43, 1  ;;  %v2397_v15 = vrot.slane %v2380_v47, 5 }
 0xcef   :  { %v2399_v32 = vrot.slane %v2381_v21, 4  ;;  %v2401_v62 = vrot.slane %v2382_v49, 3  ;;  %v2403_v20 = vrot.slane %v2383_v29, 2  ;;  %v1337_v31 = vrot.slane %v1334_v43, 2 }
 0xcf0   :  { %v2394_v35 = vsel %vm99_vm1, %v2393_v28, %v2377_v48  ;;  %v1338_v51 = vrot.slane %v1334_v43, 3  ;;  %v1339_v33 = vrot.slane %v1334_v43, 4  ;;  %v1340_v30 = vrot.slane %v1334_v43, 5 }
 0xcf1   :  { %v2396_v25 = vsel %vm102_vm2, %v2395_v34, %v2394_v35  ;;  %v1341_v52 = vrot.slane %v1334_v43, 6  ;;  %v1342_v4 = vrot.slane %v1334_v43, 7  ;;  %v3934_v53 = vsub.f32 %v3849_v0, %v1334_v43 }
 0xcf2   :  { %v2398_v14 = vsel %vm105_vm3, %v2397_v15, %v2396_v25  ;;  %v3937_v5 = vsub.f32 %v3842_v9, %v1336_v24  ;;  %v3940_v55 = vsub.f32 %v3845_v1, %v1337_v31  ;;  %v3944_v26 = vsub.f32 %v3853_v60, %v1338_v51 }
 0xcf3   :  { %v2400_v56 = vsel %vm108_vm4, %v2399_v32, %v2398_v14  ;;  %v3947_v7 = vsub.f32 %v3860_v23, %v1339_v33  ;;  %v3950_v39 = vsub.f32 %v3864_v45, %v1340_v30  ;;  %v2405_v8 = vrot.slane %v2384_v11, 1 }
 0xcf4   :  { %v2402_v0 = vsel %vm111_vm5, %v2401_v62, %v2400_v56  ;;  %v3954_v9 = vsub.f32 %v3876_v27, %v1341_v52  ;;  %v3957_v1 = vsub.f32 %v3885_v57, %v1342_v4  ;;  %v1360_v60 = vmul.f32 %v3937_v5, %v3937_v5 }
 0xcf5   :  { %v2404_v36 = vsel %vm114_vm6, %v2403_v20, %v2402_v0  ;;  %v1361_v23 = vmul.f32 %v3940_v55, %v3940_v55  ;;  %v1362_v45 = vmul.f32 %v3944_v26, %v3944_v26  ;;  %v1359_v27 = vmul.f32 %v3934_v53, %v3934_v53 }
 0xcf6   :  { %v2406_v2 = vsel %vm117_vm7, %v2405_v8, %v2404_v36  ;;  %v1363_v57 = vmul.f32 %v3947_v7, %v3947_v7  ;;  %v1364_v59 = vmul.f32 %v3950_v39, %v3950_v39  ;;  %v1375_v58 = vrot.slane %v1360_v60, 7 }
 0xcf7   :  { %v2408_v3 = vsel %vm119_vm8, %v2406_v2, 0.0  ;;  %v1377_v17 = vrot.slane %v1361_v23, 6  ;;  %v1365_v61 = vmul.f32 %v3954_v9, %v3954_v9  ;;  %v1366_v18 = vmul.f32 %v3957_v1, %v3957_v1 }
 0xcf8   :  { %2409 = vadd.xlane.f32.xlu1 %v2408_v3  ;;  %v1376_v63 = vsel %vm99_vm1, %v1375_v58, %v1359_v27  ;;  %v1379_v41 = vrot.slane %v1362_v45, 5  ;;  %v1381_v43 = vrot.slane %v1363_v57, 4  ;;  %v1383_v22 = vrot.slane %v1364_v59, 3 }
 0xcf9   :  { %v1378_v12 = vsel %vm102_vm2, %v1377_v17, %v1376_v63  ;;  %v1385_v48 = vrot.slane %v1365_v61, 2  ;;  %v1387_v49 = vrot.slane %v1366_v18, 1 }
 0xcfa   :  { %v1380_v50 = vsel %vm105_vm3, %v1379_v41, %v1378_v12 }
 0xcfb   :  { %v1382_v47 = vsel %vm108_vm4, %v1381_v43, %v1380_v50 }
 0xcfc   :  { %v1384_v21 = vsel %vm111_vm5, %v1383_v22, %v1382_v47 }
 0xcfd   :  { %v1386_v29 = vsel %vm114_vm6, %v1385_v48, %v1384_v21 }
 0xcfe   :  { %v1388_v11 = vsel %vm117_vm7, %v1387_v49, %v1386_v29 }
 0xcff   :  { %v1390_v28 = vsel %vm119_vm8, %v1388_v11, 0.0  ;;  %v4036_v11 = vld [vmem:[#allocation5 + $0x6] ss:$0 sm:$0xff] }
 0xd00   :  { %1391 = vadd.xlane.f32.xlu1 %v1390_v28 }
 0xd81   :  { %v2410_v34 = vpop.xlane.xlu1 %2409 }
 0xd82   :  { %v2411_v24 = vmul.f32 0.03125, %v2410_v34 }
 0xd84   :  { %v2412_v15 = vadd.f32 1e-05, %v2411_v24 }
 0xd86   :  { %3159 = vrsqrt.f32 %v2412_v15 }
 0xd89   :  { %v1392_v32 = vpop.xlane.xlu1 %1391 }
 0xd8a   :  { %v1393_v62 = vmul.f32 0.03125, %v1392_v32 }
 0xd8c   :  { %v1394_v20 = vadd.f32 1e-05, %v1393_v62 }
 0xd8e   :  { %3161 = vrsqrt.f32 %v1394_v20 }
 0xd93   :  { %v3160_v35 = vpop.eup %3159 }
 0xd94   :  { %v2415_v31 = vrot.slane %v3160_v35, 1  ;;  %v2416_v51 = vrot.slane %v3160_v35, 2  ;;  %v2417_v33 = vrot.slane %v3160_v35, 3  ;;  %v2418_v25 = vrot.slane %v3160_v35, 4 }
 0xd95   :  { %v2419_v30 = vrot.slane %v3160_v35, 5  ;;  %v2420_v52 = vrot.slane %v3160_v35, 6  ;;  %v2421_v4 = vrot.slane %v3160_v35, 7  ;;  %v2430_v14 = vmul.f32 %v3160_v35, %v3898_v13 }
 0xd96   :  { %v2431_v56 = vmul.f32 %v2415_v31, %v3900_v42  ;;  %v2432_v0 = vmul.f32 %v2416_v51, %v3902_v19  ;;  %v2433_v8 = vmul.f32 %v2417_v33, %v3904_v40  ;;  %v2434_v36 = vmul.f32 %v2418_v25, %v3906_v44 }
 0xd97   :  { %v2435_v60 = vmul.f32 %v2419_v30, %v3908_v38  ;;  %v2436_v23 = vmul.f32 %v2420_v52, %v3910_v54  ;;  %v2437_v45 = vmul.f32 %v2421_v4, %v3912_v46  ;;  %v2438_v2 = vmul.f32 %v3605_v37, %v2430_v14  ;;  %v4047_v30 = vld [vmem:[#allocation5 + $0x7] ss:$0 sm:$0xff] }
 0xd98   :  { %v2439_v27 = vmul.f32 %v3605_v37, %v2431_v56  ;;  %v2440_v13 = vmul.f32 %v3605_v37, %v2432_v0  ;;  %v2441_v42 = vmul.f32 %v3605_v37, %v2433_v8  ;;  %v2442_v19 = vmul.f32 %v3605_v37, %v2434_v36 }
 0xd99   :  { %v2443_v40 = vmul.f32 %v3605_v37, %v2435_v60  ;;  %v2444_v44 = vmul.f32 %v3605_v37, %v2436_v23  ;;  %v2445_v38 = vmul.f32 %v3605_v37, %v2437_v45  ;;  %v4015_v59 = vadd.f32 %v3622_v16, %v2438_v2 }
 0xd9a   :  { %v4003_v54 = vadd.f32 %v3622_v16, %v2439_v27  ;;  %v4006_v46 = vadd.f32 %v3622_v16, %v2440_v13  ;;  %v4009_v57 = vadd.f32 %v3622_v16, %v2441_v42  ;;  %v4012_v3 = vadd.f32 %v3622_v16, %v2442_v19 }
 0xd9b   :  { %v4018_v58 = vadd.f32 %v3622_v16, %v2443_v40  ;;  %v4021_v37 = vadd.f32 %v3622_v16, %v2444_v44  ;;  %v4024_v17 = vadd.f32 %v3622_v16, %v2445_v38  ;;  %v3162_v61 = vpop.eup %3161 }
 0xd9c   :  { %v2462_v18 = vrot.slane %v4003_v54, 7  ;;  %v2464_v63 = vrot.slane %v4006_v46, 6  ;;  %v2466_v41 = vrot.slane %v4009_v57, 5  ;;  %v2468_v12 = vrot.slane %v4012_v3, 4 }
 0xd9d   :  { %v2470_v43 = vrot.slane %v4018_v58, 3  ;;  %v2472_v50 = vrot.slane %v4021_v37, 2  ;;  %v2474_v22 = vrot.slane %v4024_v17, 1  ;;  %v1397_v47 = vrot.slane %v3162_v61, 1 }
 0xd9e   :  { %v2463_v16 = vsel %vm99_vm1, %v2462_v18, %v4015_v59  ;;  %v1398_v48 = vrot.slane %v3162_v61, 2  ;;  %v1399_v21 = vrot.slane %v3162_v61, 3  ;;  %v1400_v49 = vrot.slane %v3162_v61, 4 }
 0xd9f   :  { %v2465_v29 = vsel %vm102_vm2, %v2464_v63, %v2463_v16  ;;  %v1401_v28 = vrot.slane %v3162_v61, 5  ;;  %v1402_v34 = vrot.slane %v3162_v61, 6  ;;  %v1403_v24 = vrot.slane %v3162_v61, 7 }
 0xda0   :  { %v2467_v15 = vsel %vm105_vm3, %v2466_v41, %v2465_v29  ;;  %v1412_v32 = vmul.f32 %v3162_v61, %v3934_v53  ;;  %v1413_v62 = vmul.f32 %v1397_v47, %v3937_v5  ;;  %v1414_v20 = vmul.f32 %v1398_v48, %v3940_v55 }
 0xda1   :  { %v2469_v35 = vsel %vm108_vm4, %v2468_v12, %v2467_v15  ;;  %v1415_v31 = vmul.f32 %v1399_v21, %v3944_v26  ;;  %v1416_v51 = vmul.f32 %v1400_v49, %v3947_v7  ;;  %v1417_v33 = vmul.f32 %v1401_v28, %v3950_v39 }
 0xda2   :  { %v2471_v25 = vsel %vm111_vm5, %v2470_v43, %v2469_v35  ;;  %v1418_v52 = vmul.f32 %v1402_v34, %v3954_v9  ;;  %v1419_v53 = vmul.f32 %v1403_v24, %v3957_v1  ;;  %v1424_v5 = vmul.f32 %v4036_v11, %v1412_v32 }
 0xda3   :  { %v2473_v55 = vsel %vm114_vm6, %v2472_v50, %v2471_v25  ;;  %v1425_v4 = vmul.f32 %v4036_v11, %v1413_v62  ;;  %v1426_v26 = vmul.f32 %v4036_v11, %v1414_v20  ;;  %v1427_v7 = vmul.f32 %v4036_v11, %v1415_v31 }
 0xda4   :  { %v2475_v39 = vsel %vm117_vm7, %v2474_v22, %v2473_v55  ;;  %v1428_v14 = vmul.f32 %v4036_v11, %v1416_v51  ;;  %v1429_v56 = vmul.f32 %v4036_v11, %v1417_v33  ;;  %v1430_v9 = vmul.f32 %v4036_v11, %v1418_v52 }
 0xda5   :  { %3083 = vmatmul.mubr.msk.f32.vlgmr.msra.gmra.mxu1 %vm119_vm8, %v2475_v39  ;;  %v1431_v1 = vmul.f32 %v4036_v11, %v1419_v53  ;;  %v1436_v0 = vadd.f32 %v4047_v30, %v1424_v5  ;;  %v1437_v8 = vadd.f32 %v4047_v30, %v1425_v4  ;;  %v1438_v36 = vadd.f32 %v4047_v30, %v1426_v26 }
 0xda6   :  { %v1439_v60 = vadd.f32 %v4047_v30, %v1427_v7  ;;  %v1440_v23 = vadd.f32 %v4047_v30, %v1428_v14  ;;  %v1441_v45 = vadd.f32 %v4047_v30, %v1429_v56  ;;  %v1442_v2 = vadd.f32 %v4047_v30, %v1430_v9 }
 0xda7   :  { %v1443_v27 = vadd.f32 %v4047_v30, %v1431_v1  ;;  %1445 = vst.msk [vmem:[#allocation7] sm:$0x1] %vm1444_vm13, %v1436_v0  ;;  %1446 = vst.msk [vmem:[#allocation7 + $0x2] sm:$0x1] %vm1444_vm13, %v1437_v8 }
 0xda8   :  { %1447 = vst.msk [vmem:[#allocation7 + $0x4] sm:$0x1] %vm1444_vm13, %v1438_v36  ;;  %1448 = vst.msk [vmem:[#allocation7 + $0x6] sm:$0x1] %vm1444_vm13, %v1439_v60 }
 0xda9   :  { %1449 = vst.msk [vmem:[#allocation7 + $0x8] sm:$0x1] %vm1444_vm13, %v1440_v23  ;;  %1450 = vst.msk [vmem:[#allocation7 + $0xa] sm:$0x1] %vm1444_vm13, %v1441_v45 }
 0xdaa   :  { %1451 = vst.msk [vmem:[#allocation7 + $0xc] sm:$0x1] %vm1444_vm13, %v1442_v2  ;;  %1452 = vst.msk [vmem:[#allocation7 + $0xe] sm:$0x1] %vm1444_vm13, %v1443_v27 }
 0xe65   :  { %v2544_v13 = vpop.f32.mrf.mxu1 }
 0xe66   :  { %v2545_v42 = vadd.f32 %v3720_v10, %v2544_v13 }
 0xe67   :  { %v3084_v19 = vpop.f32.mrf.mxu1 }
 0xe68   :  { %v2548_v40 = vmax.f32 %v2545_v42, 0.0 }
 0xe6a   :  { %3102 = vmatmul.mubr.msk.f32.vlgmr.msra.gmra.mxu0 %vm1210_vm12, %v2548_v40 }
 0xf2a   :  { %v2618_v44 = vpop.f32.mrf.mxu0 }
 0xf2b   :  { %v2619_v38 = vadd.f32 %v3837_v6, %v2618_v44 }
 0xf2c   :  { %v3103_v61 = vpop.f32.mrf.mxu0 }
 0xf2d   :  { %v2623_v18 = vrot.slane %v2619_v38, 1  ;;  %v2624_v63 = vrot.slane %v2619_v38, 2  ;;  %v2625_v41 = vrot.slane %v2619_v38, 3  ;;  %v2626_v12 = vrot.slane %v2619_v38, 4 }
 0xf2e   :  { %v2627_v43 = vrot.slane %v2619_v38, 5  ;;  %v2628_v50 = vrot.slane %v2619_v38, 6  ;;  %v2629_v22 = vrot.slane %v2619_v38, 7  ;;  %v2638_v21 = vadd.f32 %v2619_v38, %v4015_v59 }
 0xf2f   :  { %v2639_v47 = vadd.f32 %v2623_v18, %v4003_v54  ;;  %v2640_v16 = vadd.f32 %v2624_v63, %v4006_v46  ;;  %v2641_v10 = vadd.f32 %v2625_v41, %v4009_v57  ;;  %v2642_v48 = vadd.f32 %v2626_v12, %v4012_v3 }
 0xf30   :  { %v2643_v6 = vadd.f32 %v2627_v43, %v4018_v58  ;;  %v2644_v28 = vadd.f32 %v2628_v50, %v4021_v37  ;;  %v2645_v34 = vadd.f32 %v2629_v22, %v4024_v17 }
 0xf31   :  { %v2654_v49 = vrot.slane %v2639_v47, 7  ;;  %v2656_v29 = vrot.slane %v2640_v16, 6  ;;  %v2658_v15 = vrot.slane %v2641_v10, 5  ;;  %v2660_v46 = vrot.slane %v2642_v48, 4 }
 0xf32   :  { %v2662_v32 = vrot.slane %v2643_v6, 3  ;;  %v2664_v59 = vrot.slane %v2644_v28, 2  ;;  %v2666_v62 = vrot.slane %v2645_v34, 1 }
 0xf33   :  { %v2655_v24 = vsel %vm99_vm1, %v2654_v49, %v2638_v21 }
 0xf34   :  { %v2657_v54 = vsel %vm102_vm2, %v2656_v29, %v2655_v24 }
 0xf35   :  { %v2659_v57 = vsel %vm105_vm3, %v2658_v15, %v2657_v54 }
 0xf36   :  { %v2661_v3 = vsel %vm108_vm4, %v2660_v46, %v2659_v57 }
 0xf37   :  { %v2663_v58 = vsel %vm111_vm5, %v2662_v32, %v2661_v3 }
 0xf38   :  { %v2665_v20 = vsel %vm114_vm6, %v2664_v59, %v2663_v58 }
 0xf39   :  { %v2667_v37 = vsel %vm117_vm7, %v2666_v62, %v2665_v20 }
 0xf3a   :  { %v2669_v17 = vsel %vm119_vm8, %v2667_v37, 0.0 }
 0xf3b   :  { %2670 = vadd.xlane.f32.xlu0 %v2669_v17 }
 0xfc4   :  { %v2671_v35 = vpop.xlane.xlu0 %2670 }
 0xfc5   :  { %v2672_v31 = vmul.f32 0.03125, %v2671_v35 }
 0xfc7   :  { %v2674_v51 = vrot.slane %v2672_v31, 1  ;;  %v2675_v33 = vrot.slane %v2672_v31, 2  ;;  %v2676_v25 = vrot.slane %v2672_v31, 3  ;;  %v2677_v52 = vrot.slane %v2672_v31, 4 }
 0xfc8   :  { %v2678_v53 = vrot.slane %v2672_v31, 5  ;;  %v2679_v5 = vrot.slane %v2672_v31, 6  ;;  %v2680_v55 = vrot.slane %v2672_v31, 7  ;;  %v2689_v4 = vsub.f32 %v2638_v21, %v2672_v31 }
 0xfc9   :  { %v2690_v26 = vsub.f32 %v2639_v47, %v2674_v51  ;;  %v2691_v7 = vsub.f32 %v2640_v16, %v2675_v33  ;;  %v2692_v39 = vsub.f32 %v2641_v10, %v2676_v25  ;;  %v2693_v14 = vsub.f32 %v2642_v48, %v2677_v52 }
 0xfca   :  { %v2694_v56 = vsub.f32 %v2643_v6, %v2678_v53  ;;  %v2695_v9 = vsub.f32 %v2644_v28, %v2679_v5  ;;  %v2696_v1 = vsub.f32 %v2645_v34, %v2680_v55  ;;  %v2697_v23 = vmul.f32 %v2689_v4, %v2689_v4 }
 0xfcb   :  { %v2698_v0 = vmul.f32 %v2690_v26, %v2690_v26  ;;  %v2699_v8 = vmul.f32 %v2691_v7, %v2691_v7  ;;  %v2700_v36 = vmul.f32 %v2692_v39, %v2692_v39  ;;  %v2701_v60 = vmul.f32 %v2693_v14, %v2693_v14 }
 0xfcc   :  { %v2702_v45 = vmul.f32 %v2694_v56, %v2694_v56  ;;  %v2703_v13 = vmul.f32 %v2695_v9, %v2695_v9  ;;  %v2704_v42 = vmul.f32 %v2696_v1, %v2696_v1 }
 0xfcd   :  { %v2713_v2 = vrot.slane %v2698_v0, 7  ;;  %v2715_v27 = vrot.slane %v2699_v8, 6  ;;  %v2717_v40 = vrot.slane %v2700_v36, 5  ;;  %v2719_v38 = vrot.slane %v2701_v60, 4 }
 0xfce   :  { %v2721_v18 = vrot.slane %v2702_v45, 3  ;;  %v2723_v41 = vrot.slane %v2703_v13, 2  ;;  %v2725_v43 = vrot.slane %v2704_v42, 1 }
 0xfcf   :  { %v2714_v19 = vsel %vm99_vm1, %v2713_v2, %v2697_v23 }
 0xfd0   :  { %v2716_v44 = vsel %vm102_vm2, %v2715_v27, %v2714_v19 }
 0xfd1   :  { %v2718_v61 = vsel %vm105_vm3, %v2717_v40, %v2716_v44 }
 0xfd2   :  { %v2720_v63 = vsel %vm108_vm4, %v2719_v38, %v2718_v61 }
 0xfd3   :  { %v2722_v12 = vsel %vm111_vm5, %v2721_v18, %v2720_v63 }
 0xfd4   :  { %v2724_v50 = vsel %vm114_vm6, %v2723_v41, %v2722_v12 }
 0xfd5   :  { %v2726_v22 = vsel %vm117_vm7, %v2725_v43, %v2724_v50 }
 0xfd6   :  { %v2728_v47 = vsel %vm119_vm8, %v2726_v22, 0.0 }
 0xfd7   :  { %2729 = vadd.xlane.f32.xlu0 %v2728_v47 }
0x1060   :  { %v2730_v16 = vpop.xlane.xlu0 %2729 }
0x1061   :  { %v2731_v10 = vmul.f32 0.03125, %v2730_v16 }
0x1063   :  { %v2732_v48 = vadd.f32 1e-05, %v2731_v10 }
0x1065   :  { %3163 = vrsqrt.f32 %v2732_v48 }
0x1072   :  { %v3164_v21 = vpop.eup %3163 }
0x1073   :  { %v2735_v6 = vrot.slane %v3164_v21, 1  ;;  %v2736_v49 = vrot.slane %v3164_v21, 2  ;;  %v2737_v29 = vrot.slane %v3164_v21, 3  ;;  %v2738_v28 = vrot.slane %v3164_v21, 4 }
0x1074   :  { %v2739_v34 = vrot.slane %v3164_v21, 5  ;;  %v2740_v24 = vrot.slane %v3164_v21, 6  ;;  %v2741_v15 = vrot.slane %v3164_v21, 7  ;;  %v2750_v54 = vmul.f32 %v3164_v21, %v2689_v4 }
0x1075   :  { %v2751_v46 = vmul.f32 %v2735_v6, %v2690_v26  ;;  %v2752_v57 = vmul.f32 %v2736_v49, %v2691_v7  ;;  %v2753_v32 = vmul.f32 %v2737_v29, %v2692_v39  ;;  %v2754_v3 = vmul.f32 %v2738_v28, %v2693_v14 }
0x1076   :  { %v2755_v59 = vmul.f32 %v2739_v34, %v2694_v56  ;;  %v2756_v58 = vmul.f32 %v2740_v24, %v2695_v9  ;;  %v2757_v62 = vmul.f32 %v2741_v15, %v2696_v1  ;;  %v2758_v20 = vmul.f32 %v4036_v11, %v2750_v54 }
0x1077   :  { %v2759_v37 = vmul.f32 %v4036_v11, %v2751_v46  ;;  %v2760_v17 = vmul.f32 %v4036_v11, %v2752_v57  ;;  %v2761_v35 = vmul.f32 %v4036_v11, %v2753_v32  ;;  %v2762_v31 = vmul.f32 %v4036_v11, %v2754_v3 }
0x1078   :  { %v2763_v51 = vmul.f32 %v4036_v11, %v2755_v59  ;;  %v2764_v33 = vmul.f32 %v4036_v11, %v2756_v58  ;;  %v2765_v25 = vmul.f32 %v4036_v11, %v2757_v62  ;;  %v2766_v52 = vadd.f32 %v4047_v30, %v2758_v20 }
0x1079   :  { %v2767_v53 = vadd.f32 %v4047_v30, %v2759_v37  ;;  %v2768_v5 = vadd.f32 %v4047_v30, %v2760_v17  ;;  %v2769_v55 = vadd.f32 %v4047_v30, %v2761_v35  ;;  %v2770_v4 = vadd.f32 %v4047_v30, %v2762_v31 }
0x107a   :  { %v2771_v26 = vadd.f32 %v4047_v30, %v2763_v51  ;;  %v2772_v7 = vadd.f32 %v4047_v30, %v2764_v33  ;;  %v2773_v39 = vadd.f32 %v4047_v30, %v2765_v25  ;;  %2774 = vst.msk [vmem:[#allocation7 + $0x1] sm:$0x1] %vm1444_vm13, %v2766_v52 }
0x107b   :  { %2775 = vst.msk [vmem:[#allocation7 + $0x3] sm:$0x1] %vm1444_vm13, %v2767_v53  ;;  %2776 = vst.msk [vmem:[#allocation7 + $0x5] sm:$0x1] %vm1444_vm13, %v2768_v5 }
0x107c   :  { %2777 = vst.msk [vmem:[#allocation7 + $0x7] sm:$0x1] %vm1444_vm13, %v2769_v55  ;;  %2778 = vst.msk [vmem:[#allocation7 + $0x9] sm:$0x1] %vm1444_vm13, %v2770_v4 }
0x107d   :  { %2779 = vst.msk [vmem:[#allocation7 + $0xb] sm:$0x1] %vm1444_vm13, %v2771_v26  ;;  %2780 = vst.msk [vmem:[#allocation7 + $0xd] sm:$0x1] %vm1444_vm13, %v2772_v7 }
0x107e   :  { %2781 = vst.msk [vmem:[#allocation7 + $0xf] sm:$0x1] %vm1444_vm13, %v2773_v39 }
0x107f   :  { %3216 = shalt.err (!%p3213_p0)
}
0x1080   :  { %2793 = dma.vmem_to_hbm [thread:$0]  %s2788_s1, 256, %s4141_s6, [#allocation4], %s3232_s24, %s3232_s24, %s3233_s25  }
0x1081   :  { %3229 = dma.done.wait [#allocation4], 256  }
0x1082   :  { %3230 = vsyncadd [#allocation4], 4294967040 }
0x1083   :  { %2797 = vsyncpa [#allocation3], 1 }
0x1084   :  { %2798 = vsyncpa [#allocation6], 1 }
0x1085   :  { %2799 = vsyncpa [#allocation4], 1 }

</bundles_post_ra>
